<compile_context>
chip_gen: v7x
topology: tpu7x:2x2x1
jax: 0.10.0
libtpu: 0.0.40
codegen_flags: <defaults>
</compile_context>

<pallas_src>
import functools

import jax
import jax.numpy as jnp
from jax import lax
from jax.experimental import pallas as pl
from jax.experimental.pallas import tpu as pltpu


def _round_up(v, m):
    return (v + m - 1) // m * m


def _vmem_bytes(cin, cout_p, H, W, th, itemsize=4):
    """Rough per-step VMEM working set (padded to (8,128) tiles) for row tile `th`."""
    wl = _round_up(W, 128)
    flat = _round_up(th * W, 128)
    in_block = cin * _round_up(H, 8) * wl * itemsize * 2              # double-buffered over n
    out_block = cout_p * flat * itemsize * 2                          # double-buffered
    slab_taps = 4 * cin * _round_up(th + 2, 8) * wl * itemsize        # slab + 3 shifted taps
    patches = 2 * _round_up(3 * cin, 8) * flat * itemsize             # per-ky patches (headroom)
    acc = cout_p * flat * itemsize
    weights = 2 * 3 * cout_p * _round_up(3 * cin, 128) * itemsize
    return in_block + out_block + slab_taps + patches + acc + weights


def _pick_row_tile(cin, cout_p, H, W, budget):
    """Largest row tile that fits the VMEM budget (perf review: big tiles >> small tiles).

    Whole image first (nb == 1); otherwise the largest divisor of H that is a multiple of 8
    with a lane-dense flattened output chunk (TH*W % 128 == 0)."""
    if _vmem_bytes(cin, cout_p, H, W, H) <= budget:
        return H
    cands = [t for t in range(8, H, 8) if H % t == 0 and (t * W) % 128 == 0]
    for th in sorted(cands, reverse=True):
        if _vmem_bytes(cin, cout_p, H, W, th) <= budget:
            return th
    return min(cands) if cands else H


def _conv3x3_kernel(x_ref, w_ref, b_ref, o_ref, *, th, nb, use_refl):
    # x_ref: (1, Cin, H, W)      full input image for batch element n (constant over j)
    # w_ref: (3, Cout_p, 3*Cin)  per-ky im2col weights, inner column order (kx, cin)
    # b_ref: (Cout_p, 1)         bias
    # o_ref: (1, Cout_p, th*W)   output row-chunk j, spatially flattened (lane-dense)
    cin = x_ref.shape[1]
    H = x_ref.shape[2]
    W = x_ref.shape[3]
    j = pl.program_id(1)
    x = x_ref[0]                                                 # (Cin, H, W)

    # ---- Vertically padded slab for this chunk, built directly from the resident block. ----
    if nb == 1:
        core = x
        if use_refl:
            top = x[:, 1:2, :]                                   # ReflectionPad2d(1) rows
            bot = x[:, H - 2:H - 1, :]
        else:
            top = jnp.zeros((cin, 1, W), x.dtype)                # ZeroPad2d(1) rows
            bot = jnp.zeros((cin, 1, W), x.dtype)
    else:
        row0 = pl.multiple_of(j * th, 8)                         # th % 8 == 0 when nb > 1
        core = x[:, pl.ds(row0, th), :]                          # (Cin, th, W)
        if use_refl:
            top_idx = jnp.where(j == 0, 1, j * th - 1)
            bot_idx = jnp.where(j == nb - 1, H - 2, j * th + th)
            top = x[:, pl.ds(top_idx, 1), :]
            bot = x[:, pl.ds(bot_idx, 1), :]
        else:
            top_idx = jnp.maximum(j * th - 1, 0)
            bot_idx = jnp.minimum(j * th + th, H - 1)
            top = jnp.where(j == 0, 0.0, x[:, pl.ds(top_idx, 1), :]).astype(x.dtype)
            bot = jnp.where(j == nb - 1, 0.0, x[:, pl.ds(bot_idx, 1), :]).astype(x.dtype)

    slab = jnp.concatenate([top, core, bot], axis=1)             # (Cin, th+2, W)

    # ---- Horizontal (+/-1 column) taps. ----
    if W % 128 == 0:
        # Lane-aligned width: shift on the XLU (pltpu.roll), fix the 2 boundary columns with a
        # lane-mask select on the VPU. Avoids per-tap lane-relayout copies.
        lane = lax.broadcasted_iota(jnp.int32, slab.shape, 2)
        r_from_left = pltpu.roll(slab, shift=1, axis=2)          # [x] = slab[x-1] (wraps at 0)
        r_from_right = pltpu.roll(slab, shift=W - 1, axis=2)     # [x] = slab[x+1] (wraps at W-1)
        if use_refl:
            tap_l = jnp.where(lane == 0, r_from_right, r_from_left)
            tap_r = jnp.where(lane == W - 1, r_from_left, r_from_right)
        else:
            zero = jnp.zeros_like(slab)
            tap_l = jnp.where(lane == 0, zero, r_from_left)
            tap_r = jnp.where(lane == W - 1, zero, r_from_right)
    else:
        # Small / lane-unaligned W (e.g. the 16x16 self-test): concat-of-slices path.
        if use_refl:
            lpad = slab[:, :, 1:2]
            rpad = slab[:, :, W - 2:W - 1]
        else:
            lpad = jnp.zeros((cin, slab.shape[1], 1), slab.dtype)
            rpad = jnp.zeros((cin, slab.shape[1], 1), slab.dtype)
        tap_l = jnp.concatenate([lpad, slab[:, :, :W - 1]], axis=2)   # col x -> padded col x
        tap_r = jnp.concatenate([slab[:, :, 1:], rpad], axis=2)       # col x -> padded col x+2
    tap_m = slab                                                      # col x -> padded col x+1

    # ---- 3 accumulating MXU dots over ky, K = 3*Cin each (smaller im2col temporary). ----
    cout_p = o_ref.shape[1]
    acc = jnp.zeros((cout_p, th * W), jnp.float32)
    for ky in range(3):
        patches = jnp.concatenate(
            [tap_l[:, ky:ky + th, :], tap_m[:, ky:ky + th, :], tap_r[:, ky:ky + th, :]],
            axis=0).reshape(3 * cin, th * W)                          # (3*Cin, th*W)
        acc = acc + jnp.dot(w_ref[ky], patches.astype(w_ref.dtype),
                            preferred_element_type=jnp.float32)       # (Cout_p, th*W)
    acc = acc + b_ref[...].astype(jnp.float32)                        # (Cout_p, 1) bcast
    o_ref[0] = acc.astype(o_ref.dtype)


def conv3x3_pallas(x_nchw, weight_oihw, bias, use_refl=True, *,
                   mxu_dtype=None, vmem_budget_bytes=44 * 1024 * 1024):
    """Equivalent of Conv3x3.forward. x_nchw: (N, Cin, H, W) -> (N, Cout, H, W).

    mxu_dtype: optionally jnp.bfloat16 on v6e/v7x for MXU throughput (re-check tolerance)."""
    N, Cin, H, W = x_nchw.shape
    Cout = weight_oihw.shape[0]
    Cout_p = _round_up(Cout, 8)                  # sublane-dense output stores

    TH = _pick_row_tile(Cin, Cout_p, H, W, vmem_budget_bytes)
    nb = H // TH

    # (Cout, Cin, 3, 3) -> (ky, Cout, kx, Cin) -> (3, Cout, 3*Cin); inner col order (kx, cin)
    # matches the in-kernel [tap_l | tap_m | tap_r] channel concatenation. Done once in XLA.
    w3 = jnp.transpose(weight_oihw, (2, 0, 3, 1)).reshape(3, Cout, 3 * Cin)
    b_mat = bias.reshape(Cout, 1)
    if Cout_p != Cout:
        w3 = jnp.pad(w3, ((0, 0), (0, Cout_p - Cout), (0, 0)))
        b_mat = jnp.pad(b_mat, ((0, Cout_p - Cout), (0, 0)))
    if mxu_dtype is not None:
        w3 = w3.astype(mxu_dtype)

    kernel = functools.partial(_conv3x3_kernel, th=TH, nb=nb, use_refl=use_refl)

    out_flat = pl.pallas_call(
        kernel,
        out_shape=jax.ShapeDtypeStruct((N, Cout_p, H * W), x_nchw.dtype),
        grid_spec=pltpu.PrefetchScalarGridSpec(
            num_scalar_prefetch=0,
            grid=(N, nb),
            in_specs=[
                # Full image per batch element, constant over j -> stays VMEM-resident across
                # row chunks (no re-DMA). See TODO(synk) above for the v7x halo-tiled variant.
                pl.BlockSpec((1, Cin, H, W), lambda n, j: (n, 0, 0, 0)),
                pl.BlockSpec((3, Cout_p, 3 * Cin), lambda n, j: (0, 0, 0)),
                pl.BlockSpec((Cout_p, 1), lambda n, j: (0, 0)),
            ],
            out_specs=pl.BlockSpec((1, Cout_p, TH * W), lambda n, j: (n, 0, j)),
        ),
        compiler_params=pltpu.CompilerParams(
            # No cross-step carried state anymore -> both axes parallel (v7x dual-TC).
            dimension_semantics=("parallel", "parallel"),
            vmem_limit_bytes=64 * 1024 * 1024),
    )(x_nchw, w3, b_mat)

    out = out_flat.reshape(N, Cout_p, H, W)      # free reshape back to NCHW
    return out[:, :Cout] if Cout_p != Cout else out


if __name__ == "__main__":
    key = jax.random.PRNGKey(0)
    k_x, k_w, k_b = jax.random.split(key, 3)

    N, Cin, Cout, H, W = 2, 4, 8, 16, 16

    x = jax.random.normal(k_x, (N, Cin, H, W), dtype=jnp.float32)
    # Deterministic synthetic parameters (shapes from nn.Conv2d(Cin, Cout, 3)).
    weight = jax.random.normal(k_w, (Cout, Cin, 3, 3), dtype=jnp.float32) * 0.1
    bias = jax.random.normal(k_b, (Cout,), dtype=jnp.float32) * 0.1

    # Reflection-pad path (module default).
    out = conv3x3_pallas(x, weight, bias, use_refl=True)
    jax.block_until_ready(out)

    x_pad = jnp.pad(x, ((0, 0), (0, 0), (1, 1), (1, 1)), mode="reflect")
    ref = jax.lax.conv_general_dilated(
        x_pad, weight, window_strides=(1, 1), padding="VALID",
        dimension_numbers=("NCHW", "OIHW", "NCHW")) + bias[None, :, None, None]
    assert out.shape == (N, Cout, H, W)
    assert jnp.allclose(out, ref, atol=1e-4, rtol=1e-4)

    # Zero-pad path (use_refl=False).
    out0 = conv3x3_pallas(x, weight, bias, use_refl=False)
    jax.block_until_ready(out0)
    x_pad0 = jnp.pad(x, ((0, 0), (0, 0), (1, 1), (1, 1)), mode="constant")
    ref0 = jax.lax.conv_general_dilated(
        x_pad0, weight, window_strides=(1, 1), padding="VALID",
        dimension_numbers=("NCHW", "OIHW", "NCHW")) + bias[None, :, None, None]
    assert jnp.allclose(out0, ref0, atol=1e-4, rtol=1e-4)

    print("KERNEL_OK")
</pallas_src>

<mosaic_0001>
module attributes {stable_mosaic.version = 11 : i64} {
  func.func @_conv3x3_kernel(%arg0: i32, %arg1: i32, %arg2: memref<1x4x16x16xf32, #tpu.memory_space<vmem>>, %arg3: memref<3x8x12xf32, #tpu.memory_space<vmem>>, %arg4: memref<8x1xf32, #tpu.memory_space<vmem>>, %arg5: memref<1x8x256xf32, #tpu.memory_space<vmem>>) attributes {dimension_semantics = [#tpu.dimension_semantics<parallel>, #tpu.dimension_semantics<parallel>], iteration_bounds = array<i64: 2, 1>, scalar_prefetch = 0 : i64, scratch_operands = 0 : i64, tpu.core_type = #tpu.core_type<tc>, window_params = [{transform_indices = @transform_0, window_bounds = array<i64: 1, 4, 16, 16>}, {pipeline_mode = #tpu.pipeline_mode<synchronous>, transform_indices = @transform_1, window_bounds = array<i64: 3, 8, 12>}, {pipeline_mode = #tpu.pipeline_mode<synchronous>, transform_indices = @transform_2, window_bounds = array<i64: 8, 1>}, {transform_indices = @transform_3, window_bounds = array<i64: 1, 8, 256>}]} {
    %c0 = arith.constant 0 : index
    %c0_0 = arith.constant 0 : index
    %c0_1 = arith.constant 0 : index
    %c0_2 = arith.constant 0 : index
    %0 = vector.load %arg2[%c0, %c0_0, %c0_1, %c0_2] : memref<1x4x16x16xf32, #tpu.memory_space<vmem>>, vector<1x4x16x16xf32>
    %1 = vector.shape_cast %0 : vector<1x4x16x16xf32> to vector<4x16x16xf32>
    %2 = vector.extract_strided_slice %1 {offsets = [0, 1, 0], sizes = [4, 1, 16], strides = [1, 1, 1]} : vector<4x16x16xf32> to vector<4x1x16xf32>
    %3 = vector.extract_strided_slice %1 {offsets = [0, 14, 0], sizes = [4, 1, 16], strides = [1, 1, 1]} : vector<4x16x16xf32> to vector<4x1x16xf32>
    %4 = tpu.concatenate %2, %1, %3 in 1 : vector<4x1x16xf32>, vector<4x16x16xf32>, vector<4x1x16xf32> -> vector<4x18x16xf32>
    %5 = vector.extract_strided_slice %4 {offsets = [0, 0, 1], sizes = [4, 18, 1], strides = [1, 1, 1]} : vector<4x18x16xf32> to vector<4x18x1xf32>
    %6 = vector.extract_strided_slice %4 {offsets = [0, 0, 14], sizes = [4, 18, 1], strides = [1, 1, 1]} : vector<4x18x16xf32> to vector<4x18x1xf32>
    %7 = vector.extract_strided_slice %4 {offsets = [0, 0, 0], sizes = [4, 18, 15], strides = [1, 1, 1]} : vector<4x18x16xf32> to vector<4x18x15xf32>
    %8 = tpu.concatenate %5, %7 in 2 : vector<4x18x1xf32>, vector<4x18x15xf32> -> vector<4x18x16xf32>
    %9 = vector.extract_strided_slice %4 {offsets = [0, 0, 1], sizes = [4, 18, 15], strides = [1, 1, 1]} : vector<4x18x16xf32> to vector<4x18x15xf32>
    %10 = tpu.concatenate %9, %6 in 2 : vector<4x18x15xf32>, vector<4x18x1xf32> -> vector<4x18x16xf32>
    %cst = arith.constant 0.000000e+00 : f32
    %11 = vector.broadcast %cst : f32 to vector<8x256xf32>
    %12 = vector.extract_strided_slice %8 {offsets = [0, 0, 0], sizes = [4, 16, 16], strides = [1, 1, 1]} : vector<4x18x16xf32> to vector<4x16x16xf32>
    %13 = vector.extract_strided_slice %4 {offsets = [0, 0, 0], sizes = [4, 16, 16], strides = [1, 1, 1]} : vector<4x18x16xf32> to vector<4x16x16xf32>
    %14 = vector.extract_strided_slice %10 {offsets = [0, 0, 0], sizes = [4, 16, 16], strides = [1, 1, 1]} : vector<4x18x16xf32> to vector<4x16x16xf32>
    %15 = tpu.concatenate %12, %13, %14 in 0 : vector<4x16x16xf32>, vector<4x16x16xf32>, vector<4x16x16xf32> -> vector<12x16x16xf32>
    %16 = vector.shape_cast %15 : vector<12x16x16xf32> to vector<12x256xf32>
    %c0_3 = arith.constant 0 : index
    %c0_4 = arith.constant 0 : index
    %c0_5 = arith.constant 0 : index
    %17 = vector.load %arg3[%c0_3, %c0_4, %c0_5] : memref<3x8x12xf32, #tpu.memory_space<vmem>>, vector<1x8x12xf32>
    %18 = vector.shape_cast %17 : vector<1x8x12xf32> to vector<8x12xf32>
    %cst_6 = arith.constant dense<0.000000e+00> : vector<8x256xf32>
    %19 = tpu.matmul %18, %16, %cst_6 {dimension_numbers = #tpu.dot_dimension_numbers<[1], [0], [0], [1], [0, 0, 1, 1], [], []>} : vector<8x12xf32>, vector<12x256xf32>, vector<8x256xf32> -> vector<8x256xf32>
    %20 = arith.addf %11, %19 : vector<8x256xf32>
    %21 = vector.extract_strided_slice %8 {offsets = [0, 1, 0], sizes = [4, 16, 16], strides = [1, 1, 1]} : vector<4x18x16xf32> to vector<4x16x16xf32>
    %22 = vector.extract_strided_slice %4 {offsets = [0, 1, 0], sizes = [4, 16, 16], strides = [1, 1, 1]} : vector<4x18x16xf32> to vector<4x16x16xf32>
    %23 = vector.extract_strided_slice %10 {offsets = [0, 1, 0], sizes = [4, 16, 16], strides = [1, 1, 1]} : vector<4x18x16xf32> to vector<4x16x16xf32>
    %24 = tpu.concatenate %21, %22, %23 in 0 : vector<4x16x16xf32>, vector<4x16x16xf32>, vector<4x16x16xf32> -> vector<12x16x16xf32>
    %25 = vector.shape_cast %24 : vector<12x16x16xf32> to vector<12x256xf32>
    %c1 = arith.constant 1 : index
    %c0_7 = arith.constant 0 : index
    %c0_8 = arith.constant 0 : index
    %26 = vector.load %arg3[%c1, %c0_7, %c0_8] : memref<3x8x12xf32, #tpu.memory_space<vmem>>, vector<1x8x12xf32>
    %27 = vector.shape_cast %26 : vector<1x8x12xf32> to vector<8x12xf32>
    %cst_9 = arith.constant dense<0.000000e+00> : vector<8x256xf32>
    %28 = tpu.matmul %27, %25, %cst_9 {dimension_numbers = #tpu.dot_dimension_numbers<[1], [0], [0], [1], [0, 0, 1, 1], [], []>} : vector<8x12xf32>, vector<12x256xf32>, vector<8x256xf32> -> vector<8x256xf32>
    %29 = arith.addf %20, %28 : vector<8x256xf32>
    %30 = vector.extract_strided_slice %8 {offsets = [0, 2, 0], sizes = [4, 16, 16], strides = [1, 1, 1]} : vector<4x18x16xf32> to vector<4x16x16xf32>
    %31 = vector.extract_strided_slice %4 {offsets = [0, 2, 0], sizes = [4, 16, 16], strides = [1, 1, 1]} : vector<4x18x16xf32> to vector<4x16x16xf32>
    %32 = vector.extract_strided_slice %10 {offsets = [0, 2, 0], sizes = [4, 16, 16], strides = [1, 1, 1]} : vector<4x18x16xf32> to vector<4x16x16xf32>
    %33 = tpu.concatenate %30, %31, %32 in 0 : vector<4x16x16xf32>, vector<4x16x16xf32>, vector<4x16x16xf32> -> vector<12x16x16xf32>
    %34 = vector.shape_cast %33 : vector<12x16x16xf32> to vector<12x256xf32>
    %c2 = arith.constant 2 : index
    %c0_10 = arith.constant 0 : index
    %c0_11 = arith.constant 0 : index
    %35 = vector.load %arg3[%c2, %c0_10, %c0_11] : memref<3x8x12xf32, #tpu.memory_space<vmem>>, vector<1x8x12xf32>
    %36 = vector.shape_cast %35 : vector<1x8x12xf32> to vector<8x12xf32>
    %cst_12 = arith.constant dense<0.000000e+00> : vector<8x256xf32>
    %37 = tpu.matmul %36, %34, %cst_12 {dimension_numbers = #tpu.dot_dimension_numbers<[1], [0], [0], [1], [0, 0, 1, 1], [], []>} : vector<8x12xf32>, vector<12x256xf32>, vector<8x256xf32> -> vector<8x256xf32>
    %38 = arith.addf %29, %37 : vector<8x256xf32>
    %c0_13 = arith.constant 0 : index
    %c0_14 = arith.constant 0 : index
    %39 = vector.load %arg4[%c0_13, %c0_14] : memref<8x1xf32, #tpu.memory_space<vmem>>, vector<8x1xf32>
    %40 = vector.broadcast %39 : vector<8x1xf32> to vector<8x256xf32>
    %41 = arith.addf %38, %40 : vector<8x256xf32>
    %c0_15 = arith.constant 0 : index
    %c0_16 = arith.constant 0 : index
    %c0_17 = arith.constant 0 : index
    %42 = vector.load %arg5[%c0_15, %c0_16, %c0_17] : memref<1x8x256xf32, #tpu.memory_space<vmem>>, vector<1x8x256xf32>
    %43 = vector.shape_cast %42 : vector<1x8x256xf32> to vector<8x256xf32>
    %44 = vector.shape_cast %41 : vector<8x256xf32> to vector<1x8x256xf32>
    tpu.vector_store %arg5[%c0_15, %c0_16, %c0_17], %44 {strides = array<i32>} : memref<1x8x256xf32, #tpu.memory_space<vmem>>, vector<1x8x256xf32>,
    return
  }
  func.func @transform_0(%arg0: i32, %arg1: i32) -> (i32, i32, i32, i32) {
    %c0_i32 = arith.constant 0 : i32
    %c0_i32_0 = arith.constant 0 : i32
    %c0_i32_1 = arith.constant 0 : i32
    %c0_i32_2 = arith.constant 0 : i32
    return %arg0, %c0_i32, %c0_i32_0, %c0_i32_1 : i32, i32, i32, i32
  }
  func.func @transform_1(%arg0: i32, %arg1: i32) -> (i32, i32, i32) {
    %c0_i32 = arith.constant 0 : i32
    %c0_i32_0 = arith.constant 0 : i32
    %c0_i32_1 = arith.constant 0 : i32
    %c0_i32_2 = arith.constant 0 : i32
    return %c0_i32, %c0_i32_0, %c0_i32_1 : i32, i32, i32
  }
  func.func @transform_2(%arg0: i32, %arg1: i32) -> (i32, i32) {
    %c0_i32 = arith.constant 0 : i32
    %c0_i32_0 = arith.constant 0 : i32
    %c0_i32_1 = arith.constant 0 : i32
    return %c0_i32, %c0_i32_0 : i32, i32
  }
  func.func @transform_3(%arg0: i32, %arg1: i32) -> (i32, i32, i32) {
    %c0_i32 = arith.constant 0 : i32
    %c0_i32_0 = arith.constant 0 : i32
    return %arg0, %c0_i32, %arg1 : i32, i32, i32
  }
}

</mosaic_0001>

<bundles_post_ra>
// kernel: tpu_custom_call.1
= control target key start
LH: loop header
LB: loop body
LE: loop exit
PB: predicated region body
PF: predicated region fallthrough
CT: control target
= control target key end

     0   :  { %8 = vsyncpa [#allocation3], 0  ;;  %s4889_s0 = inlined_call_operand.hbm [shape: f32[2,4,16,16], index: 0, kind: input, shape index: {}]   ;;  %s4890_s1 = inlined_call_operand.hbm [shape: f32[3,8,12], index: 1, kind: input, shape index: {}]   ;;  %s4891_s2 = inlined_call_operand.hbm [shape: f32[8,1], index: 2, kind: input, shape index: {}]   ;;  %s4892_s3 = inlined_call_operand.hbm [shape: f32[2,8,256], index: 3, kind: output, shape index: {}]  }
   0x1   :  { %10 = vsyncpa [#allocation3 + $0x1], 0 }
   0x2   :  { %11 = vsyncpa [#allocation6], 0 }
   0x3   :  { %12 = vsyncpa [#allocation4], 0 }
   0x4   :  { %14 = vsyncpa [#allocation4 + $0x1], 0  ;;  %s3199_s12 = smov 0   ;;  %s3201_s13 = smov 0  }
   0x5   :  { %s3203_s14 = smov 0   ;;  %s3205_s15 = smov 0  }
   0x6   :  { %s3207_s16 = smov 0   ;;  %s3209_s17 = smov 0  }
   0x7 LB: > { %s2623_s18 = sadd.s32 4294967295, %s3157_s17   ;;  %s2624_s19 = sadd.s32 4294967294, %s3157_s17   ;;  %s3157_s17 = sphi %s3209_s17, %s20_s17   ;;  %s3153_s16 = sphi %s3207_s16, %s5149_s16   ;;  %s3149_s15 = sphi %s3205_s15, %s5148_s15   ;;  %s3145_s14 = sphi %s3203_s14, %s5147_s14   ;;  %s3141_s13 = sphi %s3201_s13, %s5146_s13   ;;  %s3137_s12 = sphi %s3199_s12, %s5145_s12  }
   0x8   : > { %p52_p0 = scmp.ne.s32.totalorder %s3141_s13, %s3137_s12  ;;  %p3233_p1 = scmp.eq.s32.totalorder %s2623_s18, 0 }
   0x9   : > { %p3237_p2 = scmp.eq.s32.totalorder %s2623_s18, 1  ;;  %p126_p3 = scmp.eq.s32.totalorder %s2624_s19, 1 }
   0xa   : > { %s4966_s20 = scalar_select %p3233_p1, 1, 0 }
   0xb   : > { %p3243_p4 = por %p3233_p1, %p52_p0  ;;  %p2625_p5 = scmp.ge.s32.totalorder %s3157_s17, 1 }
   0xc   : > { %p3248_p6 = por %p126_p3, %p52_p0  ;;  %p133_p7 = scmp.lt.s32.totalorder %s3157_s17, 3 }
   0xd   : > { %s4968_s22 = scalar_select %p3243_p4, 1, 0 }
   0xe   : > { %s4969_s23 = scalar_select %p3248_p6, 1, 0 }
   0xf   : > { %p3253_p8 = pnand %p2625_p5, %p133_p7  ;;  %s3159_s25 = smov [#allocation5]  }
  0x10   : > { %s145_s26 = sshll.u32 %s3159_s25, 4  ;;  %s3160_s28 = smov [#allocation7]   ;;  %s3257_s26 = int_to_ptr.vmem [resolvable:$true] %s145_s26 }
  0x11   : > { %p2687_p9 = pneg %p3253_p8  ;;  %s159_s29 = sshll.u32 %s3160_s28, 4  ;;  %s3268_s29 = int_to_ptr.vmem [resolvable:$true] %s159_s29 }
  0x12   : > { %s2985_s5 = scalar_lea.hbm %s4890_s1, 384 }
  0x13   : > { %p3264_p11 = pnand %p2687_p9, %p3233_p1  ;;  %p2986_p12 = scmp.ne.s32.totalorder %s4890_s1, %s2985_s5 }
  0x14   : > { %p2992_p5 = scmp.lt.u32.totalorder %s2985_s5, %s4890_s1 }
  0x15   : > { %p2987_p13 = pneg %p3264_p11 }
  0x17   : > { %p2988_p0 = pnand %p2987_p13, %p2986_p12 }
  0x19   : > { %p2989_p3 = pneg %p2988_p0 }
  0x1b   : > { %p2994_p7 = pnand %p2992_p5, %p2989_p3 }
  0x1d   : > { %2997 = shalt.err (!%p2994_p7)
}
  0x1e   : > { %s2998_s10 = scalar_lea.vmem %s3257_s26, 384  ;;  %p3006_p1 = scmp.lt.s32.totalorder %s3257_s26, %s3257_s26 }
  0x1f   : > { %p2999_p9 = scmp.ne.s32.totalorder %s3257_s26, %s2998_s10  ;;  %p3007_p12 = scmp.lt.s32.totalorder %s2998_s10, %s2998_s10 }
  0x21   : > { %p3001_p10 = pnand %p2999_p9, %p2987_p13  ;;  %p3008_p0 = por %p3007_p12, %p3006_p1 }
  0x23   : > { %p3002_p6 = pneg %p3001_p10 }
  0x25   : > { %p3009_p4 = pnand %p3008_p0, %p3002_p6 }
  0x27   : > { %3012 = shalt.err (!%p3009_p4)
}
  0x28   : > { %s3161_s11 = smov 128   ;;  %s3162_s18 = smov 8  }
  0x29   : > { %2690 = dma.hbm_to_vmem [thread:$0]  (!%p3264_p11), %s4890_s1, 384, %s3257_s26, [#allocation6], %s3161_s11, %s3161_s11, %s3162_s18  }
  0x2a   : > { %s3013_s4 = scalar_lea.hbm %s4891_s2, 128 }
  0x2b   : > { %p3014_p1 = scmp.ne.s32.totalorder %s4891_s2, %s3013_s4  ;;  %p3020_p10 = scmp.lt.u32.totalorder %s3013_s4, %s4891_s2 }
  0x2d   : > { %p3016_p4 = pnand %p3014_p1, %p2987_p13 }
  0x2f   : > { %p3017_p6 = pneg %p3016_p4 }
  0x31   : > { %p3022_p3 = pnand %p3020_p10, %p3017_p6 }
  0x33   : > { %3025 = shalt.err (!%p3022_p3)
}
  0x34   : > { %s3026_s26 = scalar_lea.vmem %s3268_s29, 128  ;;  %p3034_p12 = scmp.lt.s32.totalorder %s3268_s29, %s3268_s29 }
  0x35   : > { %p3027_p5 = scmp.ne.s32.totalorder %s3268_s29, %s3026_s26  ;;  %p3035_p0 = scmp.lt.s32.totalorder %s3026_s26, %s3026_s26 }
  0x37   : > { %p3029_p7 = pnand %p3027_p5, %p2987_p13  ;;  %p3036_p1 = por %p3035_p0, %p3034_p12 }
  0x39   : > { %p3030_p9 = pneg %p3029_p7 }
  0x3b   : > { %p3037_p4 = pnand %p3036_p1, %p3030_p9 }
  0x3d   : > { %3040 = shalt.err (!%p3037_p4)
}
  0x3e   : > { %2693 = dma.hbm_to_vmem [thread:$0]  (!%p3264_p11), %s4891_s2, 128, %s3268_s29, [#allocation6]  }
  0x3f   : > { %s32_s19 = sadd.s32 1, %s3153_s16  ;;  %s39_s25 = sadd.s32 1, %s3145_s14 }
  0x40   : > { %p34_p13 = scmp.ge.s32.totalorder %s32_s19, 2  ;;  %p46_p6 = scmp.ne.s32.totalorder %s3145_s14, %s3141_s13 }
  0x41   : > { %p47_p10 = scmp.eq.s32.totalorder %s3157_s17, 0  ;;  %p2704_p3 = scmp.lt.s32.totalorder %s3157_s17, 2 }
  0x42   : > { %s5151_s19 = smov (%p34_p13, %s32_s19), 0  ;;  %p3335_p7 = por %p3237_p2, %p46_p6 }
  0x43   : > { %p48_p5 = por %p47_p10, %p46_p6  ;;  %s36_s28 = ssub.s32 %s3153_s16, %s5151_s19 }
  0x44   : > { %s4972_s27 = scalar_select %p3335_p7, 1, 0 }
  0x45   : > { %s170_s30 = sand.u32 1, %s3145_s14   ;;  %p37_p9 = scmp.eq.s32.totalorder %s36_s28, 0 }
  0x46   : > { %s2629_s29 = sshll.u32 %s170_s30, 6  ;;  %s2651_s4 = sshll.u32 %s3153_s16, 10 }
  0x47   : > { %s3344_s5 = scalar_select %p37_p9, %s3145_s14, %s39_s25  }
  0x48   : > { %s3349_s8 = scalar_lea.hbm %s4889_s0, %s2651_s4  ;;  %s174_s21 = scalar_lea.vmem [#allocation2], %s2629_s29 }
  0x49   : > { %s181_s26 = sshll.u32 %s174_s21, 4  ;;  %p3353_p2 = pnand %p2704_p3, %p48_p5  ;;  %s3357_s26 = int_to_ptr.vmem [resolvable:$true] %s181_s26 }
  0x4a   : > { %s3359_s10 = scalar_lea.sflag [#allocation3], %s170_s30  ;;  %s3041_s25 = scalar_lea.hbm %s3349_s8, 1024 }
  0x4b   : > { %p3042_p11 = scmp.ne.s32.totalorder %s3349_s8, %s3041_s25  ;;  %p3043_p12 = pneg %p3353_p2 }
  0x4c   : > { %s3046_s4 = scalar_lea.hbm %s4889_s0, 2048  ;;  %p3047_p4 = scmp.lt.u32.totalorder %s3349_s8, %s4889_s0 }
  0x4d   : > { %p3044_p0 = pnand %p3043_p12, %p3042_p11  ;;  %p3048_p13 = scmp.lt.u32.totalorder %s3046_s4, %s3041_s25 }
  0x4e   : > { %p3050_p10 = scmp.lt.u32.totalorder %s3041_s25, %s3349_s8 }
  0x4f   : > { %p3045_p1 = pneg %p3044_p0  ;;  %p3049_p6 = por %p3048_p13, %p3047_p4 }
  0x51   : > { %p3051_p3 = por %p3050_p10, %p3049_p6 }
  0x53   : > { %p3052_p5 = pnand %p3051_p3, %p3045_p1 }
  0x55   : > { %3055 = shalt.err (!%p3052_p5)
}
  0x56   : > { %s3056_s30 = scalar_lea.vmem %s3357_s26, 1024  ;;  %s3163_s21 = smov [#allocation2]  }
  0x57   : > { %p3057_p9 = scmp.ne.s32.totalorder %s3357_s26, %s3056_s30  ;;  %s3061_s28 = sshll.u32 %s3163_s21, 4  ;;  %s3062_s28 = int_to_ptr.vmem [resolvable:$false] %s3061_s28 }
  0x58   : > { %s3063_s29 = scalar_lea.vmem %s3062_s28, 2048  ;;  %p3064_p7 = scmp.lt.s32.totalorder %s3357_s26, %s3062_s28 }
  0x59   : > { %p3059_p11 = pnand %p3057_p9, %p3043_p12  ;;  %p3065_p4 = scmp.lt.s32.totalorder %s3063_s29, %s3056_s30 }
  0x5b   : > { %p3060_p0 = pneg %p3059_p11  ;;  %p3066_p13 = por %p3065_p4, %p3064_p7 }
  0x5d   : > { %p3067_p6 = pnand %p3066_p13, %p3060_p0 }
  0x5f   : > { %3070 = shalt.err (!%p3067_p6)
}
  0x60   : > { %2697 = dma.hbm_to_vmem [thread:$0]  (!%p3353_p2), %s3349_s8, 1024, %s3357_s26, %s3359_s10, %s3161_s11, %s3161_s11, %s3162_s18  }
  0x61   : > { %193 = sbr.rel (%p3253_p8) target bundleno = 733 (0x2dd), region = 32 }
  0x68   : > { %s3393_s25 = sand.u32 1, %s3141_s13   ;;  %p4974_p7 = scmp.ne.s32.totalorder %s4968_s22, 0 }
  0x69   : > { %s2633_s4 = sshll.u32 %s3393_s25, 6  ;;  %s196_s6 = scalar_lea.sflag [#allocation3], %s3393_s25 }
  0x6a   : > { %s199_s7 = scalar_lea.vmem [#allocation2], %s2633_s4 }
  0x6b   : > { %3124 = dma.done.wait (%p4974_p7), %s196_s6, 1024  }
  0x6c   : > { %3126 = vsyncadd (%p4974_p7), %s196_s6, 4294966272  ;;  %p4975_p12 = scmp.ne.s32.totalorder %s4966_s20, 0 }
  0x6e   : > { %3128 = dma.done.wait (%p4975_p12), [#allocation6], 512  }
  0x6f   : > { %3130 = vsyncadd (%p4975_p12), [#allocation6], 4294966784  ;;  %v3405_v0 = vld [vmem:[%s199_s7 + $0x20] sm:$0xff]  ;;  %v236_v1 = vld [vmem:[%s199_s7 + $0x28] sm:$0xff]  ;;  %vm255_vm0 = vcmask 1040384   ;;  %s3164_s20 = smov 127  }
  0x70   : > { %v231_v2 = vld [vmem:[%s199_s7] sm:$0xff]  ;;  %v262_v3 = vrot.slane %v3405_v0, 7  ;;  %v263_v4 = vrot.slane %v236_v1, 7  ;;  %v232_v5 = vld [vmem:[%s199_s7 + $0x8] sm:$0xff]  ;;  %v3408_v7 = vld [vmem:[%s199_s7 + $0x30] sm:$0xff]  ;;  %vm982_vm1 = vcmask 1046528  }
  0x71   : > { %v256_v6 = vrot.slane %v231_v2, 7  ;;  %v238_v8 = vld [vmem:[%s199_s7 + $0x38] sm:$0xff]  ;;  %v257_v9 = vrot.slane %v232_v5, 7  ;;  %v265_v10 = vrot.slane %v3408_v7, 7  ;;  %v233_v12 = vld [vmem:[%s199_s7 + $0x10] sm:$0xff]  ;;  %v243_v17 = vrot.slane %v231_v2, 1 }
  0x72   : > { %v266_v11 = vrot.slane %v238_v8, 7  ;;  %v234_v13 = vld [vmem:[%s199_s7 + $0x18] sm:$0xff]  ;;  %v3414_v14 = vsel %vm255_vm0, %v262_v3, %v263_v4  ;;  %v259_v15 = vrot.slane %v233_v12, 7  ;;  %v244_v19 = vrot.slane %v233_v12, 1  ;;  %s3165_s22 = smov 1   ;;  %s3169_s24 = smov 16  }
  0x73   : > { %v260_v16 = vrot.slane %v234_v13, 7  ;;  %318 = vrot.lane.b32.xlu1 %v3414_v14, %s3164_s20  ;;  %v3419_v18 = vsel %vm255_vm0, %v256_v6, %v257_v9  ;;  %v3432_v22 = vsel %vm255_vm0, %v243_v17, %v256_v6  ;;  %v246_v23 = vrot.slane %v3408_v7, 1  ;;  %s3170_s11 = smov 32   ;;  %s3171_s18 = smov 48  }
  0x74   : > { %306 = vrot.lane.b32.xlu0 %v3419_v18, %s3164_s20  ;;  %v3426_v20 = vsel %vm255_vm0, %v265_v10, %v266_v11  ;;  %v281_v24 = vrot.slane %v234_v13, 5  ;;  %vm1779_vm2 = vcmask 1045504   ;;  %v3438_v25 = vsel %vm255_vm0, %v244_v19, %v259_v15  ;;  %s3172_s8 = smov 64   ;;  %s3173_s26 = smov 80  }
  0x75   : > { %v3429_v21 = vsel %vm255_vm0, %v259_v15, %v260_v16  ;;  %v245_v26 = vrot.slane %v3405_v0, 1  ;;  %v280_v28 = vrot.slane %v232_v5, 5  ;;  %v1004_v31 = vrot.slane %v3419_v18, 1  ;;  %s3174_s9 = smov 96   ;;  %s3175_s10 = smov 112  }
  0x76   : > { %v1009_v27 = vrot.slane %v3429_v21, 1  ;;  %v3445_v29 = vsel %vm255_vm0, %v260_v16, %v281_v24  ;;  %v1806_v30 = vrot.slane %v3429_v21, 2  ;;  %v1801_v32 = vrot.slane %v3419_v18, 2  ;;  %s2636_s30 = sshll.u32 %s3393_s25, 4  ;;  %s2652_s21 = sshll.u32 %s3149_s15, 8 }
  0x77   : > { %324 = vrot.lane.b32.xlu1 %v3426_v20, %s3164_s20  ;;  %v1011_v33 = vrot.slane %v3445_v29, 1  ;;  %v1808_v34 = vrot.slane %v3445_v29, 2  ;;  %v3453_v35 = vsel %vm255_vm0, %v257_v9, %v280_v28  ;;  %v283_v36 = vrot.slane %v238_v8, 5  ;;  %s229_s28 = scalar_lea.vmem [#allocation8], %s2636_s30  ;;  %s4840_s7 = scalar_lea.hbm %s4892_s3, %s2652_s21 }
  0x78   : > { %312 = vrot.lane.b32.xlu0 %v3429_v21, %s3164_s20  ;;  %v1006_v37 = vrot.slane %v3453_v35, 1  ;;  %v1803_v38 = vrot.slane %v3453_v35, 2  ;;  %v1019_v39 = vrot.slane %v3426_v20, 1  ;;  %v1816_v40 = vrot.slane %v3426_v20, 2  ;;  %s2523_s29 = sshll.u32 %s229_s28, 4  ;;  %p5142_p2 = scmp.ne.s32.totalorder %s4972_s27, 0  ;;  %s4842_s29 = int_to_ptr.vmem [resolvable:$true] %s2523_s29 }
  0x79   : > { %v3464_v41 = vsel %vm982_vm1, %v1009_v27, %v1011_v33  ;;  %v3469_v42 = vsel %vm1779_vm2, %v1806_v30, %v1808_v34  ;;  %v295_v43 = vsel %vm255_vm0, %v266_v11, %v283_v36  ;;  %v282_v44 = vrot.slane %v236_v1, 5  ;;  %s3178_s15 = smov [#allocation8]  }
  0x7a   : > { %v3477_v45 = vsel %vm982_vm1, %v1004_v31, %v1006_v37  ;;  %v3482_v46 = vsel %vm1779_vm2, %v1801_v32, %v1803_v38  ;;  %v1021_v47 = vrot.slane %v295_v43, 1  ;;  %v1818_v48 = vrot.slane %v295_v43, 2 }
  0x7b   : > { %348 = vrot.lane.b32.xlu1 %v3429_v21, %s3165_s22  ;;  %v294_v49 = vsel %vm255_vm0, %v263_v4, %v282_v44  ;;  %v1014_v50 = vrot.slane %v3414_v14, 1  ;;  %v1811_v51 = vrot.slane %v3414_v14, 2  ;;  %v3166_v62 = vmov 1983009808  }
  0x7c   : > { %342 = vrot.lane.b32.xlu0 %v3419_v18, %s3165_s22  ;;  %v3490_v52 = vsel %vm982_vm1, %v1019_v39, %v1021_v47  ;;  %v3495_v53 = vsel %vm1779_vm2, %v1816_v40, %v1818_v48  ;;  %v1016_v54 = vrot.slane %v294_v49, 1  ;;  %v1813_v55 = vrot.slane %v294_v49, 2 }
  0x7d   : > { %v1319_v56 = vcombine.low %v3464_v41, %v3490_v52  ;;  %v1320_v57 = vcombine.high %v3464_v41, %v3490_v52  ;;  %v2116_v58 = vcombine.low %v3469_v42, %v3495_v53  ;;  %v2117_v59 = vcombine.high %v3469_v42, %v3495_v53 }
  0x7e   : > { %v3512_v60 = vsel %vm982_vm1, %v1014_v50, %v1016_v54  ;;  %v3517_v61 = vsel %vm1779_vm2, %v1811_v51, %v1813_v55  ;;  %v405_v63 = vunpack.c.l.s4 %v3166_v62  ;;  %v407_v1 = vlaneseq }
  0x7f   : > { %360 = vrot.lane.b32.xlu1 %v3426_v20, %s3165_s22  ;;  %v1303_v2 = vcombine.low %v3477_v45, %v3512_v60  ;;  %v1304_v4 = vcombine.high %v3477_v45, %v3512_v60  ;;  %v2100_v5 = vcombine.low %v3482_v46, %v3517_v61  ;;  %v2101_v6 = vcombine.high %v3482_v46, %v3517_v61 }
  0x80   : > { %354 = vrot.lane.b32.xlu0 %v3414_v14, %s3165_s22  ;;  %v406_v8 = vunpack.c.0.s8 %v405_v63  ;;  %v3527_v9 = vshrl.u32 %v407_v1, 7  ;;  %v638_v11 = vcombine.low %v3419_v18, %v3414_v14  ;;  %v654_v12 = vcombine.low %v3429_v21, %v3426_v20 }
  0x81   : > { %v4905_v13 = vmov 0.0   ;;  %v291_v15 = vsel %vm255_vm0, %v246_v23, %v265_v10  ;;  %v290_v17 = vsel %vm255_vm0, %v245_v26, %v262_v3  ;;  %v639_v0 = vcombine.high %v3419_v18, %v3414_v14 }
  0x82   : > { %1772 = vmatprep.mubr.f32.mxu0 %v4905_v13  ;;  %v3544_v16 = vsub.s32 %v406_v8, %v3527_v9  ;;  %1692 = vmatprep.mubr.f32.mxu1 %v4905_v13  ;;  %v655_v3 = vcombine.high %v3429_v21, %v3426_v20  ;;  %v434_v34 = vcombine.low %v3432_v22, %v290_v17  ;;  %v1008_v44 = vrot.slane %v3438_v25, 1 }
  0x83   : > { %310 = vrot.lane.b32.xlu1 %v3438_v25, %s3164_s20  ;;  %v450_v36 = vcombine.low %v3438_v25, %v291_v15  ;;  %v1013_v47 = vrot.slane %v290_v17, 1  ;;  %v435_v48 = vcombine.high %v3432_v22, %v290_v17  ;;  %v1805_v54 = vrot.slane %v3438_v25, 2 }
  0x84   : > { %304 = vrot.lane.b32.xlu0 %v3432_v22, %s3164_s20  ;;  %v3551_v19 = vrot.slane %v638_v11, %v3544_v16  ;;  %v3554_v24 = vrot.slane %v654_v12, %v3544_v16  ;;  %v3571_v23 = vrot.slane %v639_v0, %v3544_v16  ;;  %v3574_v26 = vrot.slane %v655_v3, %v3544_v16 }
  0x85   : > { %v3597_v37 = vrot.slane %v434_v34, %v3544_v16  ;;  %v3600_v38 = vrot.slane %v450_v36, %v3544_v16  ;;  %v1800_v55 = vrot.slane %v3432_v22, 2  ;;  %v1018_v62 = vrot.slane %v291_v15, 1 }
  0x86   : > { %v702_v7 = vcombine.low %v3551_v19, %v3554_v24  ;;  %v703_v10 = vcombine.high %v3551_v19, %v3554_v24  ;;  %v718_v28 = vcombine.low %v3571_v23, %v3574_v26  ;;  %v719_v33 = vcombine.high %v3571_v23, %v3574_v26 }
  0x87   : > { %322 = vrot.lane.b32.xlu1 %v291_v15, %s3164_s20  ;;  %v1810_v63 = vrot.slane %v290_v17, 2  ;;  %v3613_v1 = vrot.slane %v435_v48, %v3544_v16  ;;  %v1815_v11 = vrot.slane %v291_v15, 2  ;;  %v1802_v3 = vsel %vm1779_vm2, %v1800_v55, %v1801_v32 }
  0x88   : > { %316 = vrot.lane.b32.xlu0 %v290_v17, %s3164_s20  ;;  %v3653_v21 = vrot.slane %v1303_v2, %v3544_v16  ;;  %v3659_v14 = vrot.slane %v1319_v56, %v3544_v16  ;;  %v3690_v48 = vrot.slane %v2116_v58, %v3544_v16  ;;  %v3742_v45 = vrot.slane %v2117_v59, %v3544_v16 }
  0x89   : > { %v1817_v18 = vsel %vm1779_vm2, %v1815_v11, %v1816_v40  ;;  %v3168_v61 = vmov 1934713408   ;;  %vm376_vm3 = vcmask 7168   ;;  %vm389_vm4 = vcmask 121856  }
  0x8a   : > { %4977 = vst [vmem:[#allocation13_spill] sm:$0xff] %v3653_v21  ;;  %4978 = vst [vmem:[#allocation14_spill] sm:$0xff] %v3659_v14  ;;  %v1367_v40 = vcombine.low %v3653_v21, %v3659_v14  ;;  %vm922_vm5 = vcmask 130048   ;;  %vm925_vm6 = vcmask 261120   ;;  %vm928_vm7 = vcmask 392192  }
  0x8b   : > { %346 = vrot.lane.b32.xlu1 %v3438_v25, %s3165_s22  ;;  %4983 = vst [vmem:[#allocation19_spill] sm:$0xff] %v3690_v48  ;;  %4991 = vst [vmem:[#allocation27_spill] sm:$0xff] %v3742_v45  ;;  %vm931_vm8 = vcmask 523264   ;;  %vm934_vm9 = vcmask 654336   ;;  %vm937_vm10 = vcmask 785408   ;;  %vm940_vm11 = vcmask 916480  }
  0x8c   : > { %340 = vrot.lane.b32.xlu0 %v3432_v22, %s3165_s22  ;;  %vm1621_vm12 = vcmask 1043456   ;;  %vm3177_vm13 = vmmov 1   ;;  %vm1617_vm15 = vcmask 97280  }
  0x8d   : > { %vm4712_vm14 = vmpackc.low %vm1621_vm12, %vm3177_vm13 }
  0x8f   : > { %358 = vrot.lane.b32.xlu1 %v291_v15, %s3165_s22 }
  0x90   : > { %352 = vrot.lane.b32.xlu0 %v290_v17, %s3165_s22  ;;  %v1020_v17 = vsel %vm982_vm1, %v1018_v62, %v1019_v39 }
  0x93   : > { %314 = vrot.lane.b32.xlu1 %v3445_v29, %s3164_s20 }
  0x94   : > { %308 = vrot.lane.b32.xlu0 %v3453_v35, %s3164_s20 }
  0x97   : > { %326 = vrot.lane.b32.xlu1 %v295_v43, %s3164_s20 }
  0x98   : > { %320 = vrot.lane.b32.xlu0 %v294_v49, %s3164_s20  ;;  %s2507_s20 = scalar_lea.sflag [#allocation4], %s3393_s25 }
  0x9b   : > { %350 = vrot.lane.b32.xlu1 %v3445_v29, %s3165_s22  ;;  %v498_v29 = vcombine.low %v3597_v37, %v3600_v38 }
  0x9c   : > { %344 = vrot.lane.b32.xlu0 %v3453_v35, %s3165_s22  ;;  %v499_v35 = vcombine.high %v3597_v37, %v3600_v38 }
  0x9f   : > { %362 = vrot.lane.b32.xlu1 %v295_v43, %s3165_s22  ;;  %v1003_v43 = vrot.slane %v3432_v22, 1  ;;  %v1010_v22 = vsel %vm982_vm1, %v1008_v44, %v1009_v27 }
  0xa0   : > { %356 = vrot.lane.b32.xlu0 %v294_v49, %s3165_s22  ;;  %v451_v49 = vcombine.high %v3438_v25, %v291_v15  ;;  %v1015_v25 = vsel %vm982_vm1, %v1013_v47, %v1014_v50  ;;  %v1115_v34 = vcombine.low %v1010_v22, %v1020_v17  ;;  %v1812_v50 = vsel %vm1779_vm2, %v1810_v63, %v1811_v51  ;;  %s3071_s22 = scalar_lea.vmem %s4842_s29, 256 }
  0xa1   : > { %v1005_v0 = vsel %vm982_vm1, %v1003_v43, %v1004_v31  ;;  %v1807_v31 = vsel %vm1779_vm2, %v1805_v54, %v1806_v30  ;;  %v1896_v32 = vcombine.low %v1802_v3, %v1812_v50  ;;  %v3684_v47 = vrot.slane %v2100_v5, %v3544_v16  ;;  %p3072_p8 = scmp.ne.s32.totalorder %s4842_s29, %s3071_s22 }
  0xa2   : > { %v3616_v8 = vrot.slane %v451_v49, %v3544_v16  ;;  %v1099_v15 = vcombine.low %v1005_v0, %v1015_v25  ;;  %v3662_v30 = vrot.slane %v1115_v34, %v3544_v16  ;;  %v1912_v39 = vcombine.low %v1807_v31, %v1817_v18 }
  0xa3   : > { %v3665_v20 = vrot.slane %v1896_v32, %v3544_v16  ;;  %4982 = vst [vmem:[#allocation18_spill] sm:$0xff] %v3684_v47  ;;  %v1100_v49 = vcombine.high %v1005_v0, %v1015_v25  ;;  %v1116_v54 = vcombine.high %v1010_v22, %v1020_v17  ;;  %v2164_v55 = vcombine.low %v3684_v47, %v3690_v48  ;;  %p3073_p1 = pnand %p3072_p8, %p5142_p2 }
  0xa4   : > { %v514_v12 = vcombine.low %v3613_v1, %v3616_v8  ;;  %v515_v27 = vcombine.high %v3613_v1, %v3616_v8  ;;  %v3644_v36 = vrot.slane %v1099_v15, %v3544_v16  ;;  %4979 = vst [vmem:[#allocation15_spill] sm:$0xff] %v3662_v30  ;;  %v3674_v43 = vrot.slane %v1912_v39, %v3544_v16 }
  0xa5   : > { %4980 = vst [vmem:[#allocation16_spill] sm:$0xff] %v3665_v20  ;;  %v3695_v62 = vrot.slane %v1100_v49, %v3544_v16  ;;  %v3698_v63 = vrot.slane %v1116_v54, %v3544_v16  ;;  %v1897_v11 = vcombine.high %v1802_v3, %v1812_v50  ;;  %v1913_v5 = vcombine.high %v1807_v31, %v1817_v18  ;;  %p3074_p10 = pneg %p3073_p1 }
  0xa6   : > { %4976 = vst [vmem:[#allocation12_spill] sm:$0xff] %v3644_v36  ;;  %v1163_v51 = vcombine.low %v3644_v36, %v3662_v30  ;;  %4981 = vst [vmem:[#allocation17_spill] sm:$0xff] %v3674_v43  ;;  %v1960_v56 = vcombine.low %v3665_v20, %v3674_v43  ;;  %v3722_v34 = vrot.slane %v1304_v4, %v3544_v16 }
  0xa7   : > { %4984 = vst [vmem:[#allocation20_spill] sm:$0xff] %v3695_v62  ;;  %4985 = vst [vmem:[#allocation21_spill] sm:$0xff] %v3698_v63  ;;  %v3705_v0 = vrot.slane %v1897_v11, %v3544_v16  ;;  %v3708_v22 = vrot.slane %v1913_v5, %v3544_v16  ;;  %v3728_v50 = vrot.slane %v1320_v57, %v3544_v16 }
  0xa8   : > { %4988 = vst [vmem:[#allocation24_spill] sm:$0xff] %v3722_v34  ;;  %v3736_v32 = vrot.slane %v2101_v6, %v3544_v16  ;;  %v469_v6 = vunpack.c.l.s4 %v3168_v61 }
  0xa9   : > { %4986 = vst [vmem:[#allocation22_spill] sm:$0xff] %v3705_v0  ;;  %4987 = vst [vmem:[#allocation23_spill] sm:$0xff] %v3708_v22 }
  0xaa   : > { %4989 = vst [vmem:[#allocation25_spill] sm:$0xff] %v3728_v50  ;;  %4990 = vst [vmem:[#allocation26_spill] sm:$0xff] %v3736_v32  ;;  %v470_v54 = vunpack.c.0.s8 %v469_v6 }
  0xac   : > { %v3751_v59 = vsub.s32 %v470_v54, %v3527_v9 }
  0xae   : > { %v3773_v52 = vrot.slane %v702_v7, %v3751_v59  ;;  %v3841_v23 = vrot.slane %v514_v12, %v3751_v59  ;;  %v3847_v26 = vrot.slane %v515_v27, %v3751_v59  ;;  %v3865_v1 = vrot.slane %v1163_v51, %v3751_v59 }
  0xaf   : > { %v3874_v27 = vrot.slane %v1960_v56, %v3751_v59 }
  0xb0   : > { %4992 = vst [vmem:[#allocation28_spill] sm:$0xff] %v3773_v52  ;;  %4995 = vst [vmem:[#allocation31_spill] sm:$0xff] %v3865_v1 }
  0xb1   : > { %4996 = vst [vmem:[#allocation32_spill] sm:$0xff] %v3874_v27 }
  0xe5   : > { %v319_v60 = vpop.permute.xlu1 %318 }
  0xe6   : > { %v307_v4 = vpop.permute.xlu0 %306 }
  0xe9   : > { %v325_v46 = vpop.permute.xlu1 %324 }
  0xea   : > { %v313_v39 = vpop.permute.xlu0 %312 }
  0xed   : > { %v349_v49 = vpop.permute.xlu1 %348 }
  0xee   : > { %v343_v42 = vpop.permute.xlu0 %342  ;;  %v3754_v11 = vsel %vm376_vm3, %v313_v39, %v349_v49  ;;  %v3763_v31 = vsel %vm389_vm4, %v313_v39, %v349_v49 }
  0xef   : > { %v3782_v39 = vsel %vm376_vm3, %v307_v4, %v343_v42  ;;  %v3785_v49 = vsel %vm389_vm4, %v307_v4, %v343_v42  ;;  %v3815_v4 = vrot.slane %v498_v29, %v3751_v59  ;;  %v3821_v42 = vrot.slane %v719_v33, %v3751_v59 }
  0xf1   : > { %v361_v53 = vpop.permute.xlu1 %360  ;;  %4993 = vst [vmem:[#allocation29_spill] sm:$0xff] %v3815_v4 }
  0xf2   : > { %v3757_v5 = vsel %vm376_vm3, %v325_v46, %v361_v53  ;;  %v3760_v57 = vsel %vm389_vm4, %v325_v46, %v361_v53  ;;  %v355_v61 = vpop.permute.xlu0 %354  ;;  %v3779_v46 = vrot.slane %v703_v10, %v3751_v59  ;;  %v3806_v10 = vrot.slane %v718_v28, %v3751_v59 }
  0xf3   : > { %v622_v6 = vcombine.low %v3754_v11, %v3757_v5  ;;  %v758_v9 = vcombine.low %v3763_v31, %v3760_v57  ;;  %v3788_v53 = vsel %vm376_vm3, %v319_v60, %v355_v61  ;;  %v3791_v3 = vsel %vm389_vm4, %v319_v60, %v355_v61 }
  0xf4   : > { %v606_v19 = vcombine.low %v3782_v39, %v3788_v53  ;;  %v742_v24 = vcombine.low %v3785_v49, %v3791_v3  ;;  %v3827_v28 = vrot.slane %v499_v35, %v3751_v59  ;;  %v623_v33 = vcombine.high %v3754_v11, %v3757_v5 }
  0xf5   : > { %v311_v54 = vpop.permute.xlu1 %310  ;;  %v3796_v41 = vrot.slane %v622_v6, %v3544_v16  ;;  %v3809_v60 = vrot.slane %v758_v9, %v3544_v16  ;;  %v607_v37 = vcombine.high %v3782_v39, %v3788_v53  ;;  %v3859_v35 = vrot.slane %v1367_v40, %v3751_v59 }
  0xf6   : > { %v3793_v7 = vpop.permute.xlu0 %304  ;;  %v3830_v61 = vrot.slane %v606_v19, %v3544_v16  ;;  %v3833_v6 = vrot.slane %v742_v24, %v3544_v16  ;;  %v3880_v40 = vrot.slane %v2164_v55, %v3751_v59  ;;  %v759_v9 = vcombine.high %v3763_v31, %v3760_v57 }
  0xf7   : > { %4994 = vst [vmem:[#allocation30_spill] sm:$0xff] %v3859_v35  ;;  %v743_v19 = vcombine.high %v3785_v49, %v3791_v3  ;;  %v637_v15 = vrot.slane %v623_v33, %v3544_v16  ;;  %v621_v44 = vrot.slane %v607_v37, %v3544_v16  ;;  %v5016_v20 = vrot.slane %v3760_v57, 2 }
  0xf8   : > { %v670_v12 = vcombine.low %v3830_v61, %v3796_v41  ;;  %4997 = vst [vmem:[#allocation33_spill] sm:$0xff] %v3880_v40  ;;  %v774_v24 = vcombine.low %v3833_v6, %v3809_v60  ;;  %v775_v17 = vcombine.high %v3833_v6, %v3809_v60 }
  0xf9   : > { %v3835_v29 = vpop.permute.xlu1 %322  ;;  %v3909_v58 = vrot.slane %v743_v19, %v3544_v16  ;;  %v686_v19 = vcombine.low %v621_v44, %v637_v15  ;;  %v687_v34 = vcombine.high %v621_v44, %v637_v15 }
  0xfa   : > { %v3853_v38 = vpop.permute.xlu0 %316  ;;  %v3893_v55 = vrot.slane %v670_v12, %v3751_v59  ;;  %v3899_v51 = vrot.slane %v774_v24, %v3751_v59  ;;  %v3906_v12 = vrot.slane %v759_v9, %v3544_v16  ;;  %v671_v9 = vcombine.high %v3830_v61, %v3796_v41 }
  0xfb   : > { %v5000_v24 = vrot.slane %v3754_v11, 1 }
  0xfc   : > { %4998 = vst [vmem:[#allocation34_spill] sm:$0xff] %v3893_v55  ;;  %4999 = vst [vmem:[#allocation35_spill] sm:$0xff] %v3899_v51  ;;  %v735_v33 = vcombine.high %v3893_v55, %v3773_v52  ;;  %v806_v37 = vcombine.high %v3899_v51, %v4905_v13  ;;  %v3943_v6 = vrot.slane %v671_v9, %v3751_v59 }
  0xfd   : > { %v347_v25 = vpop.permute.xlu1 %346 }
  0xfe   : > { %v341_v2 = vpop.permute.xlu0 %340  ;;  %v380_v8 = vsel %vm376_vm3, %v311_v54, %v347_v25  ;;  %v393_v32 = vsel %vm389_vm4, %v311_v54, %v347_v25  ;;  %v2774_v13 = vpack.i.bf16 %v806_v37, %v735_v33 }
  0xff   : > { %v988_v48 = vrot.slane %v380_v8, 1  ;;  %v1028_v61 = vrot.slane %v393_v32, 1  ;;  %v1785_v45 = vrot.slane %v380_v8, 2  ;;  %v377_v44 = vsel %vm376_vm3, %v3793_v7, %v341_v2 }
 0x100   : > { %v3935_v15 = vsel %vm389_vm4, %v3793_v7, %v341_v2  ;;  %2775 = vrot.lane.b32.xlu0 %v2774_v13, %s3169_s24  ;;  %v1825_v54 = vrot.slane %v393_v32, 2  ;;  %v789_v2 = vrot.slane %v775_v17, %v3751_v59  ;;  %v3951_v7 = vrot.slane %v686_v19, %v3751_v59 }
 0x101   : > { %v359_v56 = vpop.permute.xlu1 %358  ;;  %v3954_v13 = vrot.slane %v687_v34, %v3751_v59  ;;  %v3959_v41 = vsel %vm982_vm1, %v988_v48, %v5000_v24  ;;  %v983_v9 = vrot.slane %v377_v44, 1  ;;  %v1023_v51 = vrot.slane %v3935_v15, 1 }
 0x102   : > { %v353_v50 = vpop.permute.xlu0 %352  ;;  %v386_v60 = vsel %vm376_vm3, %v3835_v29, %v359_v56  ;;  %v399_v37 = vsel %vm389_vm4, %v3835_v29, %v359_v56  ;;  %v1780_v33 = vrot.slane %v377_v44, 2  ;;  %v5001_v29 = vrot.slane %v3763_v31, 1 }
 0x103   : > { %v5002_v56 = vrot.slane %v3754_v11, 2  ;;  %v1820_v19 = vrot.slane %v3935_v15, 2  ;;  %v418_v48 = vcombine.low %v380_v8, %v386_v60  ;;  %v5004_v24 = vrot.slane %v3763_v31, 2 }
 0x104   : > { %v3967_v17 = vsel %vm982_vm1, %v1028_v61, %v5001_v29  ;;  %v419_v55 = vcombine.high %v380_v8, %v386_v60  ;;  %v554_v47 = vcombine.low %v393_v32, %v399_v37  ;;  %v998_v22 = vrot.slane %v386_v60, 1 }
 0x105   : > { %v3938_v25 = vpop.permute.xlu1 %314  ;;  %v3972_v34 = vsel %vm1779_vm2, %v1785_v45, %v5002_v56  ;;  %v3978_v52 = vsel %vm1779_vm2, %v1825_v54, %v5004_v24  ;;  %v1038_v0 = vrot.slane %v399_v37, 1  ;;  %v1795_v63 = vrot.slane %v386_v60, 2 }
 0x106   : > { %v3962_v18 = vpop.permute.xlu0 %308  ;;  %5003 = vst [vmem:[#allocation36_spill] sm:$0xff] %v3972_v34  ;;  %5005 = vst [vmem:[#allocation37_spill] sm:$0xff] %v3978_v52  ;;  %v383_v61 = vsel %vm376_vm3, %v3853_v38, %v353_v50  ;;  %v396_v45 = vsel %vm389_vm4, %v3853_v38, %v353_v50  ;;  %v5006_v56 = vrot.slane %v3782_v39, 1  ;;  %v5007_v54 = vrot.slane %v3785_v49, 1 }
 0x107   : > { %v5008_v60 = vrot.slane %v3782_v39, 2  ;;  %v555_v14 = vcombine.high %v393_v32, %v399_v37  ;;  %v5010_v50 = vrot.slane %v3785_v49, 2  ;;  %v4007_v21 = vrot.slane %v418_v48, %v3544_v16 }
 0x108   : > { %v3989_v62 = vsel %vm982_vm1, %v983_v9, %v5006_v56  ;;  %v3994_v8 = vsel %vm982_vm1, %v1023_v51, %v5007_v54  ;;  %v1835_v9 = vrot.slane %v399_v37, 2  ;;  %v402_v56 = vcombine.low %v377_v44, %v383_v61 }
 0x109   : > { %v3984_v29 = vpop.permute.xlu1 %326  ;;  %v3999_v24 = vsel %vm1779_vm2, %v1780_v33, %v5008_v60  ;;  %v4004_v38 = vsel %vm1779_vm2, %v1820_v19, %v5010_v50  ;;  %v4010_v40 = vrot.slane %v419_v55, %v3544_v16  ;;  %v4013_v51 = vrot.slane %v554_v47, %v3544_v16 }
 0x10a   : > { %5009 = vst [vmem:[#allocation38_spill] sm:$0xff] %v3999_v24  ;;  %5011 = vst [vmem:[#allocation39_spill] sm:$0xff] %v4004_v38  ;;  %v5012_v33 = vrot.slane %v3757_v5, 1  ;;  %v538_v54 = vcombine.low %v3935_v15, %v396_v45  ;;  %v4021_v19 = vpop.permute.xlu0 %320  ;;  %v5013_v48 = vrot.slane %v3760_v57, 1  ;;  %v5014_v55 = vrot.slane %v3757_v5, 2 }
 0x10b   : > { %v403_v47 = vcombine.high %v377_v44, %v383_v61  ;;  %v736_v50 = vcombine.low %v3943_v6, %v3779_v46  ;;  %v993_v27 = vrot.slane %v383_v61, 1  ;;  %v1033_v43 = vrot.slane %v396_v45, 1 }
 0x10c   : > { %v4018_v32 = vsel %vm982_vm1, %v998_v22, %v5012_v33  ;;  %v4026_v37 = vsel %vm982_vm1, %v1038_v0, %v5013_v48  ;;  %v4031_v60 = vsel %vm1779_vm2, %v1795_v63, %v5014_v55  ;;  %v4036_v22 = vrot.slane %v555_v14, %v3544_v16 }
 0x10d   : > { %5015 = vst [vmem:[#allocation40_spill] sm:$0xff] %v4031_v60  ;;  %v539_v33 = vcombine.high %v3935_v15, %v396_v45  ;;  %v4042_v0 = vsel %vm1779_vm2, %v1835_v9, %v5016_v20  ;;  %v4045_v48 = vrot.slane %v402_v56, %v3544_v16  ;;  %v1790_v63 = vrot.slane %v383_v61, 2  ;;  %v351_v55 = vpop.permute.xlu1 %350 }
 0x10e   : > { %5017 = vst [vmem:[#allocation41_spill] sm:$0xff] %v4042_v0  ;;  %v1830_v44 = vrot.slane %v396_v45, 2  ;;  %v4054_v36 = vrot.slane %v538_v54, %v3544_v16  ;;  %v4057_v20 = vrot.slane %v403_v47, %v3544_v16  ;;  %v2784_v9 = vpack.i.bf16 %v789_v2, %v736_v50  ;;  %v345_v1 = vpop.permute.xlu0 %344 }
 0x10f   : > { %v737_v61 = vcombine.high %v3943_v6, %v3779_v46  ;;  %v5018_v45 = vmov 0.0   ;;  %v4065_v14 = vrot.slane %v539_v33, %v3544_v16  ;;  %v5019_v15 = vrot.slane %v3788_v53, 1 }
 0x110   : > { %v807_v56 = vcombine.high %v789_v2, %v5018_v45  ;;  %v5020_v47 = vrot.slane %v3791_v3, 1  ;;  %v466_v46 = vcombine.low %v4045_v48, %v4007_v21  ;;  %v5021_v6 = vrot.slane %v3788_v53, 2  ;;  %2785 = vrot.lane.b32.xlu0 %v2784_v9, %s3170_s11 }
 0x111   : > { %v4070_v54 = vsel %vm982_vm1, %v993_v27, %v5019_v15  ;;  %v5023_v33 = vrot.slane %v3791_v3, 2  ;;  %v570_v15 = vcombine.low %v4054_v36, %v4013_v51  ;;  %v363_v0 = vpop.permute.xlu1 %362  ;;  %v392_v52 = vsel %vm389_vm4, %v3962_v18, %v345_v1 }
 0x112   : > { %v4075_v50 = vsel %vm982_vm1, %v1033_v43, %v5020_v47  ;;  %v4082_v2 = vsel %vm1779_vm2, %v1790_v63, %v5021_v6  ;;  %v738_v43 = vcombine.low %v3951_v7, %v3806_v10  ;;  %v382_v63 = vsel %vm376_vm3, %v3938_v25, %v351_v55  ;;  %v357_v34 = vpop.permute.xlu0 %356 }
 0x113   : > { %5022 = vst [vmem:[#allocation42_spill] sm:$0xff] %v4082_v2  ;;  %v4087_v30 = vsel %vm1779_vm2, %v1830_v44, %v5023_v33  ;;  %v395_v47 = vsel %vm389_vm4, %v3938_v25, %v351_v55  ;;  %v2794_v6 = vpack.i.bf16 %v807_v56, %v737_v61  ;;  %v5025_v33 = vcombine.low %v3909_v58, %v3906_v12 }
 0x114   : > { %5024 = vst [vmem:[#allocation43_spill] sm:$0xff] %v4087_v30  ;;  %v379_v55 = vsel %vm376_vm3, %v3962_v18, %v345_v1  ;;  %v991_v56 = vrot.slane %v382_v63, 1  ;;  %v1031_v9 = vrot.slane %v395_v47, 1  ;;  %v739_v60 = vcombine.high %v3951_v7, %v3806_v10 }
 0x115   : > { %v798_v27 = vrot.slane %v5025_v33, %v3751_v59  ;;  %2795 = vrot.lane.b32.xlu0 %v2794_v6, %s3171_s18  ;;  %v4118_v33 = vrot.slane %v466_v46, %v3751_v59  ;;  %v4125_v25 = vrot.slane %v570_v15, %v3751_v59  ;;  %v388_v44 = vsel %vm376_vm3, %v3984_v29, %v363_v0 }
 0x116   : > { %v401_v18 = vsel %vm389_vm4, %v3984_v29, %v363_v0  ;;  %v1001_v7 = vrot.slane %v388_v44, 1  ;;  %v1828_v2 = vrot.slane %v395_v47, 2  ;;  %v986_v24 = vrot.slane %v379_v55, 1 }
 0x117   : > { %v2804_v61 = vpack.i.bf16 %v798_v27, %v738_v43  ;;  %5026 = vst [vmem:[#allocation44_spill] sm:$0xff] %v4118_v33  ;;  %5027 = vst [vmem:[#allocation45_spill] sm:$0xff] %v4125_v25  ;;  %v808_v43 = vcombine.high %v798_v27, %v5018_v45  ;;  %v531_v6 = vcombine.high %v4118_v33, %v3815_v4  ;;  %v1041_v15 = vrot.slane %v401_v18, 1 }
 0x118   : > { %v602_v1 = vcombine.high %v4125_v25, %v5018_v45  ;;  %v1788_v27 = vrot.slane %v382_v63, 2  ;;  %v385_v46 = vsel %vm376_vm3, %v4021_v19, %v357_v34  ;;  %v1026_v4 = vrot.slane %v392_v52, 1 }
 0x119   : > { %2805 = vrot.lane.b32.xlu0 %v2804_v61, %s3172_s8  ;;  %v1783_v33 = vrot.slane %v379_v55, 2  ;;  %v1798_v0 = vrot.slane %v388_v44, 2  ;;  %v5028_v10 = vrot.slane %v3754_v11, 1  ;;  %v5029_v25 = vrot.slane %v3763_v31, 1 }
 0x11a   : > { %v2779_v29 = vpack.i.bf16 %v602_v1, %v531_v6  ;;  %v2814_v63 = vpack.i.bf16 %v808_v43, %v739_v60  ;;  %v1838_v47 = vrot.slane %v401_v18, 2  ;;  %v5031_v61 = vrot.slane %v3757_v5, 1 }
 0x11b   : > { %v4146_v30 = vsel %vm982_vm1, %v5028_v10, %v991_v56  ;;  %v4151_v38 = vsel %vm982_vm1, %v5029_v25, %v1031_v9  ;;  %v5032_v44 = vrot.slane %v3760_v57, 1  ;;  %v398_v56 = vsel %vm389_vm4, %v4021_v19, %v357_v34 }
 0x11c   : > { %5030 = vst [vmem:[#allocation46_spill] sm:$0xff] %v4151_v38  ;;  %2780 = vrot.lane.b32.xlu1 %v2779_v29, %s3169_s24  ;;  %v4157_v55 = vsel %vm982_vm1, %v5031_v61, %v1001_v7  ;;  %v996_v10 = vrot.slane %v385_v46, 1  ;;  %v5034_v9 = vrot.slane %v3754_v11, 2  ;;  %v5035_v25 = vrot.slane %v3763_v31, 2 }
 0x11d   : > { %v4162_v6 = vsel %vm982_vm1, %v5032_v44, %v1041_v15  ;;  %v5037_v18 = vrot.slane %v3782_v39, 1  ;;  %v1823_v7 = vrot.slane %v392_v52, 2  ;;  %2815 = vrot.lane.b32.xlu0 %v2814_v63, %s3173_s26  ;;  %v5038_v34 = vrot.slane %v3785_v49, 1 }
 0x11e   : > { %5033 = vst [vmem:[#allocation47_spill] sm:$0xff] %v4162_v6  ;;  %v4169_v60 = vsel %vm1779_vm2, %v5034_v9, %v1788_v27  ;;  %v4174_v43 = vsel %vm1779_vm2, %v5035_v25, %v1828_v2  ;;  %v5040_v19 = vrot.slane %v3782_v39, 2  ;;  %v5042_v2 = vrot.slane %v3757_v5, 2 }
 0x11f   : > { %5036 = vst [vmem:[#allocation48_spill] sm:$0xff] %v4174_v43  ;;  %v4179_v1 = vsel %vm982_vm1, %v5037_v18, %v986_v24  ;;  %v4185_v11 = vsel %vm982_vm1, %v5038_v34, %v1026_v4  ;;  %v5043_v52 = vrot.slane %v3788_v53, 1  ;;  %v1287_v27 = vcombine.low %v4146_v30, %v4157_v55 }
 0x120   : > { %5039 = vst [vmem:[#allocation49_spill] sm:$0xff] %v4185_v11  ;;  %v4190_v31 = vsel %vm1779_vm2, %v5040_v19, %v1783_v33  ;;  %v4195_v15 = vsel %vm1779_vm2, %v5042_v2, %v1798_v0  ;;  %v1423_v4 = vcombine.low %v4151_v38, %v4162_v6  ;;  %v1036_v39 = vrot.slane %v398_v56, 1 }
 0x121   : > { %5041 = vst [vmem:[#allocation50_spill] sm:$0xff] %v4190_v31  ;;  %v4200_v24 = vsel %vm982_vm1, %v5043_v52, %v996_v10  ;;  %v5044_v5 = vrot.slane %v3760_v57, 2  ;;  %v1793_v0 = vrot.slane %v385_v46, 2  ;;  %v740_v63 = vcombine.low %v3954_v13, %v3821_v42 }
 0x122   : > { %v1271_v33 = vcombine.low %v4179_v1, %v4200_v24  ;;  %v5046_v61 = vcombine.high %v4045_v48, %v4007_v21  ;;  %v2084_v10 = vcombine.low %v4169_v60, %v4195_v15  ;;  %v5047_v9 = vrot.slane %v3791_v3, 1 }
 0x123   : > { %v4211_v29 = vsel %vm1779_vm2, %v5044_v5, %v1838_v47  ;;  %v1833_v57 = vrot.slane %v398_v56, 2  ;;  %v571_v46 = vcombine.high %v4054_v36, %v4013_v51  ;;  %v5049_v47 = vrot.slane %v3785_v49, 2 }
 0x124   : > { %5045 = vst [vmem:[#allocation51_spill] sm:$0xff] %v4211_v29  ;;  %v481_v44 = vrot.slane %v5046_v61, %v3751_v59  ;;  %v4224_v25 = vsel %vm982_vm1, %v5047_v9, %v1036_v39  ;;  %v5051_v48 = vrot.slane %v3788_v53, 2  ;;  %v5053_v56 = vcombine.high %v3909_v58, %v3906_v12 }
 0x125   : > { %5048 = vst [vmem:[#allocation52_spill] sm:$0xff] %v4224_v25  ;;  %v4231_v18 = vsel %vm1779_vm2, %v5049_v47, %v1823_v7  ;;  %v1407_v21 = vcombine.low %v4185_v11, %v4224_v25  ;;  %v4245_v36 = vrot.slane %v1287_v27, %v3544_v16  ;;  %v4248_v49 = vrot.slane %v1423_v4, %v3544_v16 }
 0x126   : > { %5050 = vst [vmem:[#allocation53_spill] sm:$0xff] %v4231_v18  ;;  %v4238_v34 = vsel %vm1779_vm2, %v5051_v48, %v1793_v0  ;;  %v805_v19 = vrot.slane %v5053_v56, %v3751_v59  ;;  %v2220_v51 = vcombine.low %v4174_v43, %v4211_v29  ;;  %v4253_v7 = vrot.slane %v1271_v33, %v3544_v16 }
 0x127   : > { %5052 = vst [vmem:[#allocation54_spill] sm:$0xff] %v4238_v34  ;;  %v4256_v53 = vrot.slane %v1407_v21, %v3544_v16  ;;  %v532_v52 = vcombine.low %v481_v44, %v3827_v28  ;;  %v585_v58 = vrot.slane %v571_v46, %v3751_v59  ;;  %v4261_v12 = vrot.slane %v2084_v10, %v3544_v16 }
 0x128   : > { %v2824_v2 = vpack.i.bf16 %v805_v19, %v740_v63  ;;  %v5054_v27 = vrot.slane %v3791_v3, 2  ;;  %v2068_v39 = vcombine.low %v4190_v31, %v4238_v34  ;;  %v741_v33 = vcombine.high %v3954_v13, %v3821_v42  ;;  %v5086_v31 = vld [vmem:[#allocation32_spill] sm:$0xff]  ;;  %v5087_v34 = vld [vmem:[#allocation33_spill] sm:$0xff] }
 0x129   : > { %v2789_v5 = vpack.i.bf16 %v585_v58, %v532_v52  ;;  %v809_v0 = vcombine.high %v805_v19, %v5018_v45  ;;  %v533_v63 = vcombine.high %v481_v44, %v3827_v28  ;;  %v603_v61 = vcombine.high %v585_v58, %v5018_v45 }
 0x12a   : > { %v4266_v4 = vsel %vm1779_vm2, %v5054_v27, %v1833_v57  ;;  %2825 = vrot.lane.b32.xlu0 %v2824_v2, %s3174_s9  ;;  %v5056_v3 = vcombine.low %v4057_v20, %v4010_v40  ;;  %v586_v9 = vcombine.low %v4065_v14, %v4036_v22  ;;  %v1335_v42 = vcombine.low %v4253_v7, %v4245_v36 }
 0x12b   : > { %5055 = vst [vmem:[#allocation55_spill] sm:$0xff] %v4266_v4  ;;  %v1439_v13 = vcombine.low %v4256_v53, %v4248_v49  ;;  %v4287_v57 = vrot.slane %v2220_v51, %v3544_v16  ;;  %v2204_v28 = vcombine.low %v4231_v18, %v4266_v4  ;;  %2790 = vrot.lane.b32.xlu1 %v2789_v5, %s3170_s11 }
 0x12c   : > { %v490_v10 = vrot.slane %v5056_v3, %v3751_v59  ;;  %v2834_v44 = vpack.i.bf16 %v809_v0, %v741_v33  ;;  %v5057_v46 = vcombine.high %v4057_v20, %v4010_v40  ;;  %v594_v48 = vrot.slane %v586_v9, %v3751_v59 }
 0x12d   : > { %v4301_v56 = vrot.slane %v1335_v42, %v3751_v59  ;;  %v587_v19 = vcombine.high %v4065_v14, %v4036_v22  ;;  %v4306_v51 = vrot.slane %v2068_v39, %v3544_v16  ;;  %v2799_v2 = vpack.i.bf16 %v603_v61, %v533_v63 }
 0x12e   : > { %v4296_v47 = vrot.slane %v5057_v46, %v3751_v59  ;;  %v534_v21 = vcombine.low %v490_v10, %v3841_v23  ;;  %2835 = vrot.lane.b32.xlu0 %v2834_v44, %s3175_s10  ;;  %v4310_v40 = vrot.slane %v1439_v13, %v3751_v59  ;;  %v5060_v20 = vcombine.low %v3989_v62, %v4070_v54  ;;  %v5064_v44 = vld [vmem:[#allocation38_spill] sm:$0xff] }
 0x12f   : > { %5058 = vst [vmem:[#allocation56_spill] sm:$0xff] %v4301_v56  ;;  %v535_v58 = vcombine.high %v490_v10, %v3841_v23  ;;  %v604_v27 = vcombine.high %v594_v48, %v5018_v45  ;;  %v1400_v22 = vcombine.high %v4301_v56, %v3859_v35  ;;  %v4323_v39 = vrot.slane %v2204_v28, %v3544_v16  ;;  %v5065_v46 = vld [vmem:[#allocation42_spill] sm:$0xff]  ;;  %v5071_v35 = vld [vmem:[#allocation43_spill] sm:$0xff] }
 0x130   : > { %5059 = vst [vmem:[#allocation57_spill] sm:$0xff] %v4310_v40  ;;  %v1075_v52 = vrot.slane %v5060_v20, %v3544_v16  ;;  %2800 = vrot.lane.b32.xlu1 %v2799_v2, %s3171_s18  ;;  %v1471_v33 = vcombine.high %v4310_v40, %v5018_v45  ;;  %v5061_v23 = vcombine.low %v3959_v41, %v4018_v32  ;;  %v5070_v40 = vld [vmem:[#allocation39_spill] sm:$0xff] }
 0x131   : > { %v5062_v0 = vcombine.low %v3994_v8, %v4075_v50  ;;  %v2809_v61 = vpack.i.bf16 %v594_v48, %v534_v21  ;;  %v536_v3 = vcombine.low %v4296_v47, %v3847_v26  ;;  %v601_v10 = vrot.slane %v587_v19, %v3751_v59  ;;  %v5068_v21 = vld [vmem:[#allocation40_spill] sm:$0xff] }
 0x132   : > { %v1091_v5 = vrot.slane %v5061_v23, %v3544_v16  ;;  %v5063_v9 = vcombine.low %v3967_v17, %v4026_v37  ;;  %v2844_v13 = vpack.i.bf16 %v1471_v33, %v1400_v22  ;;  %v5066_v2 = vcombine.low %v5064_v44, %v5065_v46  ;;  %v5067_v23 = vld [vmem:[#allocation36_spill] sm:$0xff]  ;;  %v5073_v22 = vld [vmem:[#allocation37_spill] sm:$0xff] }
 0x133   : > { %v4336_v63 = vrot.slane %v5062_v0, %v3544_v16  ;;  %v5069_v48 = vcombine.low %v5067_v23, %v5068_v21  ;;  %v2819_v14 = vpack.i.bf16 %v604_v27, %v535_v58  ;;  %v5072_v56 = vcombine.low %v5070_v40, %v5071_v35  ;;  %v5074_v33 = vld [vmem:[#allocation41_spill] sm:$0xff] }
 0x134   : > { %v1227_v42 = vrot.slane %v5063_v9, %v3544_v16  ;;  %v1131_v28 = vcombine.low %v1075_v52, %v1091_v5  ;;  %v1872_v20 = vrot.slane %v5066_v2, %v3544_v16  ;;  %v5075_v18 = vcombine.low %v5073_v22, %v5074_v33  ;;  %2810 = vrot.lane.b32.xlu1 %v2809_v61, %s3172_s8  ;;  %v5078_v61 = vld [vmem:[#allocation31_spill] sm:$0xff] }
 0x135   : > { %v1888_v0 = vrot.slane %v5069_v48, %v3544_v16  ;;  %v4358_v9 = vrot.slane %v5072_v56, %v3544_v16  ;;  %2845 = vrot.lane.b32.xlu0 %v2844_v13, %s3169_s24  ;;  %v2132_v2 = vcombine.low %v4306_v51, %v4261_v12  ;;  %v1132_v43 = vcombine.high %v1075_v52, %v1091_v5  ;;  %v5080_v52 = vld [vmem:[#allocation12_spill] sm:$0xff]  ;;  %v5081_v5 = vld [vmem:[#allocation15_spill] sm:$0xff] }
 0x136   : > { %v1235_v19 = vcombine.low %v4336_v63, %v1227_v42  ;;  %v4364_v4 = vrot.slane %v5075_v18, %v3544_v16  ;;  %v4369_v58 = vrot.slane %v1131_v28, %v3751_v59  ;;  %v2236_v18 = vcombine.low %v4323_v39, %v4287_v57  ;;  %v5083_v28 = vld [vmem:[#allocation16_spill] sm:$0xff] }
 0x137   : > { %v1928_v27 = vcombine.low %v1872_v20, %v1888_v0  ;;  %v4388_v11 = vrot.slane %v2132_v2, %v3751_v59  ;;  %v5082_v38 = vcombine.high %v5080_v52, %v5081_v5  ;;  %v2829_v2 = vpack.i.bf16 %v601_v10, %v536_v3  ;;  %v5089_v52 = vld [vmem:[#allocation14_spill] sm:$0xff] }
 0x138   : > { %5076 = vst [vmem:[#allocation38_spill] sm:$0xff] %v4369_v58  ;;  %v4374_v56 = vrot.slane %v1235_v19, %v3751_v59  ;;  %v2032_v48 = vcombine.low %v4358_v9, %v4364_v4  ;;  %v1196_v13 = vcombine.high %v4369_v58, %v5078_v61  ;;  %v5084_v61 = vld [vmem:[#allocation17_spill] sm:$0xff]  ;;  %2820 = vrot.lane.b32.xlu1 %v2819_v14, %s3173_s26 }
 0x139   : > { %v4385_v29 = vrot.slane %v1928_v27, %v3751_v59  ;;  %v4399_v6 = vrot.slane %v5082_v38, %v3751_v59  ;;  %v5085_v27 = vcombine.high %v5083_v28, %v5084_v61  ;;  %v4420_v28 = vrot.slane %v1132_v43, %v3751_v59  ;;  %v5091_v43 = vld [vmem:[#allocation20_spill] sm:$0xff] }
 0x13a   : > { %5077 = vst [vmem:[#allocation42_spill] sm:$0xff] %v4374_v56  ;;  %v1267_v19 = vcombine.high %v4374_v56, %v5018_v45  ;;  %v4393_v25 = vrot.slane %v2032_v48, %v3751_v59  ;;  %v4411_v48 = vrot.slane %v2236_v18, %v3751_v59  ;;  %v537_v14 = vcombine.high %v4296_v47, %v3847_v26 }
 0x13b   : > { %v4405_v58 = vrot.slane %v5085_v27, %v3751_v59  ;;  %v1993_v5 = vcombine.high %v4385_v29, %v5086_v31  ;;  %v605_v3 = vcombine.high %v601_v10, %v5018_v45  ;;  %v1336_v18 = vcombine.high %v4253_v7, %v4245_v36  ;;  %v5092_v31 = vld [vmem:[#allocation21_spill] sm:$0xff]  ;;  %v5094_v10 = vld [vmem:[#allocation22_spill] sm:$0xff]  ;;  %v5095_v36 = vld [vmem:[#allocation23_spill] sm:$0xff] }
 0x13c   : > { %5079 = vst [vmem:[#allocation36_spill] sm:$0xff] %v4393_v25  ;;  %v2854_v38 = vpack.i.bf16 %v1267_v19, %v1196_v13  ;;  %v2064_v61 = vcombine.high %v4393_v25, %v5018_v45  ;;  %v1929_v27 = vcombine.high %v1872_v20, %v1888_v0  ;;  %v1236_v13 = vcombine.high %v4336_v63, %v1227_v42  ;;  %v5088_v19 = vld [vmem:[#allocation13_spill] sm:$0xff] }
 0x13d   : > { %v5090_v56 = vcombine.high %v5088_v19, %v5089_v52  ;;  %v5093_v26 = vcombine.low %v5091_v43, %v5092_v31  ;;  %v5096_v7 = vcombine.low %v5094_v10, %v5095_v36  ;;  %v1084_v63 = vcombine.high %v3959_v41, %v4018_v32  ;;  %2830 = vrot.lane.b32.xlu1 %v2829_v2, %s3174_s9  ;;  %v5098_v52 = vld [vmem:[#allocation19_spill] sm:$0xff] }
 0x13e   : > { %2855 = vrot.lane.b32.xlu0 %v2854_v38, %s3169_s24  ;;  %v1220_v42 = vcombine.high %v3967_v17, %v4026_v37  ;;  %v2197_v0 = vcombine.high %v4388_v11, %v5087_v34  ;;  %v1197_v41 = vcombine.low %v4420_v28, %v4399_v6  ;;  %v4465_v17 = vrot.slane %v1929_v27, %v3751_v59 }
 0x13f   : > { %v4433_v25 = vrot.slane %v5090_v56, %v3751_v59  ;;  %v4439_v47 = vrot.slane %v5093_v26, %v3751_v59  ;;  %v4445_v20 = vrot.slane %v5096_v7, %v3751_v59  ;;  %v5097_v56 = vld [vmem:[#allocation18_spill] sm:$0xff]  ;;  %v2864_v26 = vpack.i.bf16 %v2064_v61, %v1993_v5 }
 0x140   : > { %v5099_v38 = vcombine.high %v5097_v56, %v5098_v52  ;;  %v2268_v7 = vcombine.high %v4411_v48, %v5018_v45  ;;  %v1068_v32 = vcombine.high %v3989_v62, %v4070_v54  ;;  %v2839_v37 = vpack.i.bf16 %v605_v3, %v537_v14  ;;  %v5104_v52 = vld [vmem:[#allocation52_spill] sm:$0xff] }
 0x141   : > { %v4470_v2 = vrot.slane %v1336_v18, %v3751_v59  ;;  %v2133_v56 = vcombine.high %v4306_v51, %v4261_v12  ;;  %v1881_v5 = vcombine.high %v5067_v23, %v5068_v21  ;;  %v1288_v61 = vcombine.high %v4146_v30, %v4157_v55  ;;  %v5100_v18 = vld [vmem:[#allocation54_spill] sm:$0xff] }
 0x142   : > { %v4458_v19 = vrot.slane %v5099_v38, %v3751_v59  ;;  %2865 = vrot.lane.b32.xlu0 %v2864_v26, %s3169_s24  ;;  %v1250_v27 = vrot.slane %v1236_v13, %v3751_v59  ;;  %v2033_v62 = vcombine.high %v4358_v9, %v4364_v4  ;;  %v2017_v54 = vcombine.high %v5073_v22, %v5074_v33  ;;  %v5105_v38 = vld [vmem:[#allocation49_spill] sm:$0xff] }
 0x143   : > { %v1204_v14 = vcombine.high %v3994_v8, %v4075_v50  ;;  %v1865_v12 = vcombine.high %v5064_v44, %v5065_v46  ;;  %2840 = vrot.lane.b32.xlu1 %v2839_v37, %s3175_s10  ;;  %v1440_v30 = vcombine.high %v4256_v53, %v4248_v49  ;;  %v1272_v55 = vcombine.high %v4179_v1, %v4200_v24 }
 0x144   : > { %v2849_v51 = vpack.i.bf16 %v2268_v7, %v2197_v0  ;;  %v2874_v23 = vpack.i.bf16 %v1250_v27, %v1197_v41  ;;  %v1994_v4 = vcombine.low %v4465_v17, %v4405_v58  ;;  %v1401_v21 = vcombine.low %v4470_v2, %v4433_v25 }
 0x145   : > { %v4498_v8 = vrot.slane %v2133_v56, %v3751_v59  ;;  %v4501_v50 = vrot.slane %v1068_v32, %v3544_v16  ;;  %v4504_v44 = vrot.slane %v1084_v63, %v3544_v16  ;;  %v2001_v1 = vcombine.high %v5070_v40, %v5071_v35  ;;  %v5103_v63 = vld [vmem:[#allocation46_spill] sm:$0xff] }
 0x146   : > { %v4509_v24 = vrot.slane %v1288_v61, %v3544_v16  ;;  %v2085_v49 = vcombine.high %v4169_v60, %v4195_v15  ;;  %2875 = vrot.lane.b32.xlu0 %v2874_v23, %s3170_s11  ;;  %v2047_v53 = vrot.slane %v2033_v62, %v3751_v59  ;;  %v1454_v46 = vrot.slane %v1440_v30, %v3751_v59 }
 0x147   : > { %2850 = vrot.lane.b32.xlu1 %v2849_v51, %s3169_s24  ;;  %v2237_v9 = vcombine.high %v4323_v39, %v4287_v57  ;;  %v1198_v35 = vcombine.high %v4420_v28, %v4399_v6  ;;  %v1268_v40 = vcombine.high %v1250_v27, %v5018_v45  ;;  %v1147_v60 = vcombine.low %v4501_v50, %v4504_v44  ;;  %v5101_v57 = vld [vmem:[#allocation50_spill] sm:$0xff]  ;;  %v5102_v28 = vld [vmem:[#allocation47_spill] sm:$0xff]  ;;  %s3075_s24 = sshll.u32 %s3178_s15, 4  ;;  %s3076_s24 = int_to_ptr.vmem [resolvable:$false] %s3075_s24 }
 0x148   : > { %v2884_v22 = vpack.i.bf16 %v2047_v53, %v1994_v4  ;;  %v4525_v15 = vrot.slane %v1865_v12, %v3544_v16  ;;  %v4528_v33 = vrot.slane %v1881_v5, %v3544_v16  ;;  %v4531_v3 = vrot.slane %v1272_v55, %v3544_v16  ;;  %p3078_p3 = scmp.lt.s32.totalorder %s4842_s29, %s3076_s24 }
 0x149   : > { %v2069_v39 = vcombine.high %v5101_v57, %v5100_v18  ;;  %v2859_v13 = vpack.i.bf16 %v1454_v46, %v1401_v21  ;;  %v2198_v6 = vcombine.low %v4498_v8, %v4458_v19  ;;  %v1424_v0 = vcombine.high %v5103_v63, %v5102_v28  ;;  %v5109_v21 = vld [vmem:[#allocation51_spill] sm:$0xff] }
 0x14a   : > { %v1408_v26 = vcombine.high %v5105_v38, %v5104_v52  ;;  %2885 = vrot.lane.b32.xlu0 %v2884_v22, %s3170_s11  ;;  %v4543_v7 = vrot.slane %v1204_v14, %v3544_v16  ;;  %v4546_v41 = vrot.slane %v1220_v42, %v3544_v16  ;;  %v2251_v32 = vrot.slane %v2237_v9, %v3751_v59  ;;  %v5112_v9 = vld [vmem:[#allocation53_spill] sm:$0xff] }
 0x14b   : > { %2860 = vrot.lane.b32.xlu1 %v2859_v13, %s3170_s11  ;;  %v2894_v37 = vpack.i.bf16 %v1268_v40, %v1198_v35  ;;  %v1402_v56 = vcombine.high %v4470_v2, %v4433_v25  ;;  %v1472_v5 = vcombine.high %v1454_v46, %v5018_v45  ;;  %v1995_v61 = vcombine.high %v4465_v17, %v4405_v58  ;;  %v5106_v17 = vld [vmem:[#allocation24_spill] sm:$0xff]  ;;  %v5107_v2 = vld [vmem:[#allocation25_spill] sm:$0xff]  ;;  %v5111_v46 = vld [vmem:[#allocation55_spill] sm:$0xff] }
 0x14c   : > { %v2065_v27 = vcombine.high %v2047_v53, %v5018_v45  ;;  %v1155_v62 = vrot.slane %v1147_v60, %v3751_v59  ;;  %v1944_v42 = vcombine.low %v4525_v15, %v4528_v33  ;;  %v4560_v14 = vrot.slane %v2085_v49, %v3544_v16  ;;  %v5110_v49 = vld [vmem:[#allocation48_spill] sm:$0xff] }
 0x14d   : > { %v4563_v12 = vrot.slane %v2069_v39, %v3544_v16  ;;  %v2869_v30 = vpack.i.bf16 %v2251_v32, %v2198_v6  ;;  %v1351_v25 = vcombine.low %v4531_v3, %v4509_v24  ;;  %v1251_v58 = vcombine.low %v4543_v7, %v4546_v41 }
 0x14e   : > { %2895 = vrot.lane.b32.xlu0 %v2894_v37, %s3171_s18  ;;  %v5108_v55 = vcombine.low %v5106_v17, %v5107_v2  ;;  %v4577_v23 = vrot.slane %v2001_v1, %v3544_v16  ;;  %v4580_v4 = vrot.slane %v2017_v54, %v3544_v16  ;;  %v2221_v53 = vcombine.high %v5110_v49, %v5109_v21 }
 0x14f   : > { %v2205_v35 = vcombine.high %v5112_v9, %v5111_v46  ;;  %2870 = vrot.lane.b32.xlu1 %v2869_v30, %s3170_s11  ;;  %v4588_v40 = vrot.slane %v1408_v26, %v3544_v16  ;;  %v4591_v22 = vrot.slane %v1424_v0, %v3544_v16  ;;  %v2879_v60 = vpack.i.bf16 %v1472_v5, %v1402_v56  ;;  %v5113_v56 = vld [vmem:[#allocation26_spill] sm:$0xff]  ;;  %v5114_v5 = vld [vmem:[#allocation27_spill] sm:$0xff]  ;;  %s3077_s11 = scalar_lea.vmem %s3076_s24, 512 }
 0x150   : > { %v4574_v51 = vrot.slane %v5108_v55, %v3751_v59  ;;  %v2904_v1 = vpack.i.bf16 %v2065_v27, %v1995_v61  ;;  %v1199_v18 = vcombine.low %v1155_v62, %v4439_v47  ;;  %v1952_v54 = vrot.slane %v1944_v42, %v3751_v59  ;;  %p3079_p5 = scmp.lt.s32.totalorder %s3077_s11, %s3071_s22 }
 0x151   : > { %v2199_v57 = vcombine.high %v4498_v8, %v4458_v19  ;;  %v2269_v39 = vcombine.high %v2251_v32, %v5018_v45  ;;  %v1359_v13 = vrot.slane %v1351_v25, %v3751_v59  ;;  %v2148_v6 = vcombine.low %v4563_v12, %v4560_v14 }
 0x152   : > { %2905 = vrot.lane.b32.xlu0 %v2904_v1, %s3171_s18  ;;  %v1259_v28 = vrot.slane %v1251_v58, %v3751_v59  ;;  %v2048_v63 = vcombine.low %v4577_v23, %v4580_v4  ;;  %v1455_v0 = vcombine.low %v4588_v40, %v4591_v22  ;;  %v4609_v19 = vrot.slane %v2205_v35, %v3544_v16  ;;  %p3080_p9 = por %p3079_p5, %p3078_p3 }
 0x153   : > { %2880 = vrot.lane.b32.xlu1 %v2879_v60, %s3171_s18  ;;  %v4612_v8 = vrot.slane %v2221_v53, %v3544_v16  ;;  %v1996_v38 = vcombine.low %v1952_v54, %v4445_v20  ;;  %v2889_v26 = vpack.i.bf16 %v2269_v39, %v2199_v57  ;;  %v1403_v32 = vcombine.low %v1359_v13, %v4574_v51 }
 0x154   : > { %v2914_v52 = vpack.i.bf16 %v1259_v28, %v1199_v18  ;;  %v2156_v37 = vrot.slane %v2148_v6, %v3751_v59  ;;  %v5115_v61 = vcombine.low %v5113_v56, %v5114_v5  ;;  %v2056_v42 = vrot.slane %v2048_v63, %v3751_v59  ;;  %p3081_p11 = pnand %p3080_p9, %p3074_p10 }
 0x155   : > { %v1463_v16 = vrot.slane %v1455_v0, %v3751_v59  ;;  %v2252_v30 = vcombine.low %v4609_v19, %v4612_v8  ;;  %v1200_v25 = vcombine.high %v1155_v62, %v4439_v47  ;;  %v1269_v58 = vcombine.high %v1259_v28, %v5018_v45 }
 0x156   : > { %v2188_v27 = vrot.slane %v5115_v61, %v3751_v59  ;;  %2915 = vrot.lane.b32.xlu0 %v2914_v52, %s3172_s8  ;;  %v2924_v55 = vpack.i.bf16 %v2056_v42, %v1996_v38  ;;  %v1148_v21 = vcombine.high %v4501_v50, %v4504_v44  ;;  %v5116_v35 = vcombine.high %v5091_v43, %v5092_v31 }
 0x157   : > { %2890 = vrot.lane.b32.xlu1 %v2889_v26, %s3171_s18  ;;  %v2899_v49 = vpack.i.bf16 %v1463_v16, %v1403_v32  ;;  %v2260_v46 = vrot.slane %v2252_v30, %v3751_v59  ;;  %v2934_v9 = vpack.i.bf16 %v1269_v58, %v1200_v25  ;;  %v1997_v62 = vcombine.high %v1952_v54, %v4445_v20 }
 0x158   : > { %v2200_v53 = vcombine.low %v2156_v37, %v2188_v27  ;;  %v1194_v47 = vrot.slane %v5116_v35, %v3751_v59  ;;  %v2066_v60 = vcombine.high %v2056_v42, %v5018_v45  ;;  %v1162_v50 = vrot.slane %v1148_v21, %v3751_v59 }
 0x159   : > { %v1945_v44 = vcombine.high %v4525_v15, %v4528_v33  ;;  %v1404_v18 = vcombine.high %v1359_v13, %v4574_v51  ;;  %v1473_v57 = vcombine.high %v1463_v16, %v5018_v45  ;;  %v1352_v39 = vcombine.high %v4531_v3, %v4509_v24 }
 0x15a   : > { %2925 = vrot.lane.b32.xlu0 %v2924_v55, %s3172_s8  ;;  %v2909_v1 = vpack.i.bf16 %v2260_v46, %v2200_v53  ;;  %v1252_v31 = vcombine.high %v4543_v7, %v4546_v41  ;;  %v5117_v43 = vcombine.high %v5106_v17, %v5107_v2  ;;  %v5118_v15 = vcombine.high %v5094_v10, %v5095_v36 }
 0x15b   : > { %2900 = vrot.lane.b32.xlu1 %v2899_v49, %s3172_s8  ;;  %v2944_v51 = vpack.i.bf16 %v2066_v60, %v1997_v62  ;;  %v2201_v54 = vcombine.high %v2156_v37, %v2188_v27  ;;  %v1201_v24 = vcombine.low %v1162_v50, %v1194_v47  ;;  %v1959_v3 = vrot.slane %v1945_v44, %v3751_v59 }
 0x15c   : > { %v1398_v20 = vrot.slane %v5117_v43, %v3751_v59  ;;  %v1991_v33 = vrot.slane %v5118_v15, %v3751_v59  ;;  %v2919_v13 = vpack.i.bf16 %v1473_v57, %v1404_v18  ;;  %v2270_v7 = vcombine.high %v2260_v46, %v5018_v45  ;;  %v5120_v43 = vld [vmem:[#allocation35_spill] sm:$0xff]  ;;  %v5121_v15 = vld [vmem:[#allocation34_spill] sm:$0xff] }
 0x15d   : > { %v1366_v41 = vrot.slane %v1352_v39, %v3751_v59  ;;  %v2149_v6 = vcombine.high %v4563_v12, %v4560_v14  ;;  %v1266_v17 = vrot.slane %v1252_v31, %v3751_v59  ;;  %v2049_v10 = vcombine.high %v4577_v23, %v4580_v4 }
 0x15e   : > { %2935 = vrot.lane.b32.xlu0 %v2934_v9, %s3173_s26  ;;  %v1456_v36 = vcombine.high %v4588_v40, %v4591_v22  ;;  %v1998_v28 = vcombine.low %v1959_v3, %v1991_v33  ;;  %v2929_v63 = vpack.i.bf16 %v2270_v7, %v2201_v54  ;;  %v5119_v14 = vcombine.high %v5113_v56, %v5114_v5 }
 0x15f   : > { %2910 = vrot.lane.b32.xlu1 %v2909_v1, %s3172_s8  ;;  %v2954_v2 = vpack.i.bf16 %v1266_v17, %v1201_v24  ;;  %v1405_v0 = vcombine.low %v1366_v41, %v1398_v20  ;;  %v2163_v52 = vrot.slane %v2149_v6, %v3751_v59  ;;  %v2063_v23 = vrot.slane %v2049_v10, %v3751_v59 }
 0x160   : > { %v2195_v12 = vrot.slane %v5119_v14, %v3751_v59  ;;  %v1470_v4 = vrot.slane %v1456_v36, %v3751_v59  ;;  %v2253_v40 = vcombine.high %v4609_v19, %v4612_v8  ;;  %v1202_v38 = vcombine.high %v1162_v50, %v1194_v47 }
 0x161   : > { %v2964_v22 = vpack.i.bf16 %v2063_v23, %v1998_v28  ;;  %v1270_v26 = vcombine.high %v1266_v17, %v5018_v45  ;;  %v1406_v27 = vcombine.high %v1366_v41, %v1398_v20  ;;  %v1999_v25 = vcombine.high %v1959_v3, %v1991_v33  ;;  %v5122_v33 = vld [vmem:[#allocation28_spill] sm:$0xff] }
 0x162   : > { %2945 = vrot.lane.b32.xlu0 %v2944_v51, %s3173_s26  ;;  %v2939_v32 = vpack.i.bf16 %v1470_v4, %v1405_v0  ;;  %v2202_v37 = vcombine.low %v2163_v52, %v2195_v12  ;;  %v2267_v56 = vrot.slane %v2253_v40, %v3751_v59  ;;  %v1474_v42 = vcombine.high %v1470_v4, %v5018_v45  ;;  %v2496_v59 = vld [vmem:[#allocation7] sm:$0xff] }
 0x163   : > { %2920 = vrot.lane.b32.xlu1 %v2919_v13, %s3173_s26  ;;  %v2974_v5 = vpack.i.bf16 %v1270_v26, %v1202_v38  ;;  %v2203_v8 = vcombine.high %v2163_v52, %v2195_v12  ;;  %v2067_v58 = vcombine.high %v2063_v23, %v5018_v45  ;;  %v3176_v55 = vmov 0  }
 0x164   : > { %v2949_v61 = vpack.i.bf16 %v2267_v56, %v2202_v37  ;;  %v2959_v19 = vpack.i.bf16 %v1474_v42, %v1406_v27  ;;  %v2271_v16 = vcombine.high %v2267_v56, %v5018_v45  ;;  %2984 = vset.pattern.permute.xlu0 %v3176_v55  ;;  %v5123_v51 = vcombine.low %v5121_v15, %v5122_v33  ;;  %v5126_v27 = vld [vmem:[#allocation56_spill] sm:$0xff]  ;;  %v5127_v42 = vld [vmem:[#allocation30_spill] sm:$0xff]  ;;  %v5129_v55 = vld [vmem:[#allocation45_spill] sm:$0xff] }
 0x165   : > { %v2979_v21 = vpack.i.bf16 %v2067_v58, %v1999_v25  ;;  %v5133_v15 = vld [vmem:[#allocation38_spill] sm:$0xff]  ;;  %v5134_v33 = vld [vmem:[#allocation31_spill] sm:$0xff] }
 0x166   : > { %2955 = vrot.lane.b32.xlu0 %v2954_v2, %s3174_s9  ;;  %v2969_v30 = vpack.i.bf16 %v2271_v16, %v2203_v8 }
 0x167   : > { %2930 = vrot.lane.b32.xlu1 %v2929_v63, %s3173_s26 }
 0x16a   : > { %2965 = vrot.lane.b32.xlu0 %v2964_v22, %s3174_s9 }
 0x16b   : > { %2940 = vrot.lane.b32.xlu1 %v2939_v32, %s3174_s9 }
 0x16e   : > { %2975 = vrot.lane.b32.xlu0 %v2974_v5, %s3175_s10 }
 0x16f   : > { %2950 = vrot.lane.b32.xlu1 %v2949_v61, %s3174_s9 }
 0x172   : > { %2499 = vperm.xlu0 %2984, %v2496_v59   ;;  %v2776_v49 = vpop.permute.xlu0 %2775 }
 0x173   : > { %2960 = vrot.lane.b32.xlu1 %v2959_v19, %s3175_s10  ;;  %v2778_v62 = vunpack.i.h.bf16 %v2776_v49  ;;  %v2777_v60 = vunpack.i.l.bf16 %v2776_v49  ;;  %v5128_v19 = vcombine.low %v5126_v27, %v5127_v42 }
 0x175   : > { %v944_v20 = vsel %vm922_vm5, %v5120_v43, %v2778_v62  ;;  %v943_v54 = vsel %vm922_vm5, %v5123_v51, %v2777_v60  ;;  %v5135_v51 = vcombine.low %v5133_v15, %v5134_v33 }
 0x177   : > { %2970 = vrot.lane.b32.xlu1 %v2969_v30, %s3175_s10 }
 0x17b   : > { %2980 = vrot.lane.b32.xlu1 %v2979_v21, %s3175_s10 }
 0x182   : > { %v2786_v53 = vpop.permute.xlu0 %2785 }
 0x183   : > { %v2788_v50 = vunpack.i.h.bf16 %v2786_v53  ;;  %v2787_v44 = vunpack.i.l.bf16 %v2786_v53 }
 0x185   : > { %v945_v13 = vsel %vm925_vm6, %v943_v54, %v2787_v44  ;;  %v946_v7 = vsel %vm925_vm6, %v944_v20, %v2788_v50 }
 0x187   : > { %v2796_v46 = vpop.permute.xlu0 %2795 }
 0x188   : > { %v2798_v1 = vunpack.i.h.bf16 %v2796_v46  ;;  %v2797_v18 = vunpack.i.l.bf16 %v2796_v46 }
 0x18a   : > { %v947_v10 = vsel %vm928_vm7, %v945_v13, %v2797_v18  ;;  %v948_v36 = vsel %vm928_vm7, %v946_v7, %v2798_v1 }
 0x18b   : > { %v2806_v9 = vpop.permute.xlu0 %2805 }
 0x18c   : > { %v2808_v57 = vunpack.i.h.bf16 %v2806_v9  ;;  %v2807_v39 = vunpack.i.l.bf16 %v2806_v9  ;;  %v5130_v9 = vld [vmem:[#allocation44_spill] sm:$0xff] }
 0x18e   : > { %v2781_v47 = vpop.permute.xlu1 %2780  ;;  %v949_v2 = vsel %vm931_vm8, %v947_v10, %v2807_v39  ;;  %v950_v28 = vsel %vm931_vm8, %v948_v36, %v2808_v57 }
 0x18f   : > { %v2816_v35 = vpop.permute.xlu0 %2815  ;;  %v2783_v61 = vunpack.i.h.bf16 %v2781_v47  ;;  %v2782_v16 = vunpack.i.l.bf16 %v2781_v47 }
 0x190   : > { %v2818_v24 = vunpack.i.h.bf16 %v2816_v35  ;;  %v2817_v3 = vunpack.i.l.bf16 %v2816_v35  ;;  %v5131_v35 = vld [vmem:[#allocation29_spill] sm:$0xff] }
 0x191   : > { %v924_v21 = vsel %vm922_vm5, %v5129_v55, %v2783_v61  ;;  %v5132_v62 = vcombine.low %v5130_v9, %v5131_v35  ;;  %v5141_v35 = vld [vmem:[#allocation57_spill] sm:$0xff] }
 0x192   : > { %v951_v0 = vsel %vm934_vm9, %v949_v2, %v2817_v3  ;;  %v952_v52 = vsel %vm934_vm9, %v950_v28, %v2818_v24 }
 0x193   : > { %v923_v60 = vsel %vm922_vm5, %v5132_v62, %v2782_v16 }
 0x19c   : > { %v2826_v31 = vpop.permute.xlu0 %2825 }
 0x19d   : > { %v2828_v41 = vunpack.i.h.bf16 %v2826_v31  ;;  %v2827_v6 = vunpack.i.l.bf16 %v2826_v31  ;;  %v2791_v17 = vpop.permute.xlu1 %2790 }
 0x19e   : > { %v2793_v25 = vunpack.i.h.bf16 %v2791_v17  ;;  %v2792_v58 = vunpack.i.l.bf16 %v2791_v17 }
 0x19f   : > { %v953_v4 = vsel %vm937_vm10, %v951_v0, %v2827_v6  ;;  %v954_v40 = vsel %vm937_vm10, %v952_v52, %v2828_v41  ;;  %v5136_v52 = vld [vmem:[#allocation32_spill] sm:$0xff] }
 0x1a0   : > { %v2836_v63 = vpop.permute.xlu0 %2835  ;;  %v926_v47 = vsel %vm925_vm6, %v923_v60, %v2792_v58  ;;  %v927_v57 = vsel %vm925_vm6, %v924_v21, %v2793_v25  ;;  %v5139_v25 = vcombine.low %v4388_v11, %v5087_v34 }
 0x1a1   : > { %v2838_v14 = vunpack.i.h.bf16 %v2836_v63  ;;  %v2837_v12 = vunpack.i.l.bf16 %v2836_v63 }
 0x1a2   : > { %v2801_v23 = vpop.permute.xlu1 %2800 }
 0x1a3   : > { %v955_v22 = vsel %vm940_vm11, %v953_v4, %v2837_v12  ;;  %v956_v38 = vsel %vm940_vm11, %v954_v40, %v2838_v14  ;;  %v2802_v59 = vunpack.i.l.bf16 %v2801_v23  ;;  %v2803_v49 = vunpack.i.h.bf16 %v2801_v23 }
 0x1a4   : > { %v2659_v32 = vpack.c.bf16 %v956_v38, %v955_v22  ;;  %v5137_v14 = vcombine.low %v4385_v29, %v5136_v52 }
 0x1a5   : > { %v929_v31 = vsel %vm928_vm7, %v926_v47, %v2802_v59  ;;  %v930_v24 = vsel %vm928_vm7, %v927_v57, %v2803_v49 }
 0x1a6   : > { %v2811_v37 = vpop.permute.xlu1 %2810  ;;  %2661 = vmatprep.subr.msk.bf16.mxu0 %vm4712_vm14, %v2659_v32 }
 0x1a7   : > { %v4718_v56 = vpop.permute.xlu0 %2845  ;;  %v2812_v53 = vunpack.i.l.bf16 %v2811_v37  ;;  %v2813_v50 = vunpack.i.h.bf16 %v2811_v37 }
 0x1a8   : > { %v2847_v5 = vunpack.i.l.bf16 %v4718_v56 }
 0x1a9   : > { %v932_v3 = vsel %vm931_vm8, %v929_v31, %v2812_v53  ;;  %v933_v7 = vsel %vm931_vm8, %v930_v24, %v2813_v50  ;;  %v5140_v53 = vld [vmem:[#allocation36_spill] sm:$0xff] }
 0x1aa   : > { %v4725_v8 = vsel %vm922_vm5, %v5128_v19, %v2847_v5  ;;  %v2821_v30 = vpop.permute.xlu1 %2820  ;;  %v5138_v5 = vld [vmem:[#allocation42_spill] sm:$0xff]  ;;  %v2848_v19 = vunpack.i.h.bf16 %v4718_v56 }
 0x1ab   : > { %v2822_v44 = vunpack.i.l.bf16 %v2821_v30  ;;  %v2823_v39 = vunpack.i.h.bf16 %v2821_v30  ;;  %v957_v30 = vld [vmem:[#allocation5] sm:$0xff] }
 0x1ac   : > { %v1602_v62 = vsel %vm922_vm5, %v5141_v35, %v2848_v19 }
 0x1ad   : > { %v935_v41 = vsel %vm934_vm9, %v932_v3, %v2822_v44  ;;  %v936_v10 = vsel %vm934_vm9, %v933_v7, %v2823_v39 }
 0x1af   : > { %v2831_v1 = vpop.permute.xlu1 %2830 }
 0x1b0   : > { %v2856_v46 = vpop.permute.xlu0 %2855  ;;  %v2833_v43 = vunpack.i.h.bf16 %v2831_v1  ;;  %v2832_v20 = vunpack.i.l.bf16 %v2831_v1 }
 0x1b1   : > { %v2857_v18 = vunpack.i.l.bf16 %v2856_v46  ;;  %v2858_v36 = vunpack.i.h.bf16 %v2856_v46 }
 0x1b2   : > { %v938_v63 = vsel %vm937_vm10, %v935_v41, %v2832_v20  ;;  %v939_v0 = vsel %vm937_vm10, %v936_v10, %v2833_v43 }
 0x1b3   : > { %v1587_v54 = vsel %vm922_vm5, %v5135_v51, %v2857_v18  ;;  %v1588_v61 = vsel %vm922_vm5, %v5138_v5, %v2858_v36 }
 0x1b4   : > { %v2866_v13 = vpop.permute.xlu0 %2865 }
 0x1b5   : > { %v2841_v6 = vpop.permute.xlu1 %2840  ;;  %v2867_v17 = vunpack.i.l.bf16 %v2866_v13  ;;  %v2868_v27 = vunpack.i.h.bf16 %v2866_v13 }
 0x1b6   : > { %v2843_v2 = vunpack.i.h.bf16 %v2841_v6  ;;  %v2842_v28 = vunpack.i.l.bf16 %v2841_v6 }
 0x1b7   : > { %v2384_v12 = vsel %vm922_vm5, %v5137_v14, %v2867_v17  ;;  %v2385_v56 = vsel %vm922_vm5, %v5140_v53, %v2868_v27 }
 0x1b8   : > { %v941_v23 = vsel %vm940_vm11, %v938_v63, %v2842_v28  ;;  %v942_v4 = vsel %vm940_vm11, %v939_v0, %v2843_v2  ;;  %v2876_v40 = vpop.permute.xlu0 %2875 }
 0x1b9   : > { %v2851_v22 = vpop.permute.xlu1 %2850  ;;  %v2662_v38 = vpack.c.bf16 %v942_v4, %v941_v23  ;;  %v2878_v32 = vunpack.i.h.bf16 %v2876_v40  ;;  %v2877_v37 = vunpack.i.l.bf16 %v2876_v40 }
 0x1ba   : > { %v2852_v42 = vunpack.i.l.bf16 %v2851_v22  ;;  %v2853_v60 = vunpack.i.h.bf16 %v2851_v22 }
 0x1bb   : > { %2664 = vmatpush1.bf16.msk.msra.mxu0 %vm4712_vm14, %v2662_v38  ;;  %v1589_v29 = vsel %vm925_vm6, %v1587_v54, %v2877_v37  ;;  %v1590_v16 = vsel %vm925_vm6, %v1588_v61, %v2878_v32 }
 0x1bc   : > { %v2398_v58 = vsel %vm922_vm5, %v5139_v25, %v2852_v42  ;;  %v2886_v59 = vpop.permute.xlu0 %2885  ;;  %v2399_v43 = vsel %vm922_vm5, %v4411_v48, %v2853_v60 }
 0x1bd   : > { %v2861_v55 = vpop.permute.xlu1 %2860  ;;  %v2888_v21 = vunpack.i.h.bf16 %v2886_v59  ;;  %v2887_v49 = vunpack.i.l.bf16 %v2886_v59 }
 0x1be   : > { %v2863_v46 = vunpack.i.h.bf16 %v2861_v55  ;;  %v2862_v9 = vunpack.i.l.bf16 %v2861_v55  ;;  %2642 = vmatmul.mubr.msk.f32.vlgmr.msra.gmra.mrb[0].mxu0 %vm1617_vm15, %v957_v30 }
 0x1bf   : > { %v2386_v50 = vsel %vm925_vm6, %v2384_v12, %v2887_v49  ;;  %v2387_v11 = vsel %vm925_vm6, %v2385_v56, %v2888_v21  ;;  %2487 = vmatprep.mubr.f32.mxu0 %v5018_v45 }
 0x1c0   : > { %v1604_v34 = vsel %vm925_vm6, %v1602_v62, %v2863_v46  ;;  %v1603_v44 = vsel %vm925_vm6, %v4725_v8, %v2862_v9  ;;  %v2896_v1 = vpop.permute.xlu0 %2895 }
 0x1c1   : > { %v2871_v18 = vpop.permute.xlu1 %2870  ;;  %v2898_v47 = vunpack.i.h.bf16 %v2896_v1  ;;  %v2897_v57 = vunpack.i.l.bf16 %v2896_v1 }
 0x1c2   : > { %v2873_v39 = vunpack.i.h.bf16 %v2871_v18  ;;  %v2872_v31 = vunpack.i.l.bf16 %v2871_v18 }
 0x1c3   : > { %v1591_v20 = vsel %vm928_vm7, %v1589_v29, %v2897_v57  ;;  %v1592_v15 = vsel %vm928_vm7, %v1590_v16, %v2898_v47 }
 0x1c4   : > { %v2400_v45 = vsel %vm925_vm6, %v2398_v58, %v2872_v31  ;;  %v2401_v33 = vsel %vm925_vm6, %v2399_v43, %v2873_v39  ;;  %v2906_v51 = vpop.permute.xlu0 %2905 }
 0x1c5   : > { %v2881_v54 = vpop.permute.xlu1 %2880  ;;  %v2908_v8 = vunpack.i.h.bf16 %v2906_v51  ;;  %v2907_v24 = vunpack.i.l.bf16 %v2906_v51 }
 0x1c6   : > { %v2883_v3 = vunpack.i.h.bf16 %v2881_v54  ;;  %v2882_v13 = vunpack.i.l.bf16 %v2881_v54 }
 0x1c7   : > { %v2388_v7 = vsel %vm928_vm7, %v2386_v50, %v2907_v24  ;;  %v2389_v41 = vsel %vm928_vm7, %v2387_v11, %v2908_v8 }
 0x1c8   : > { %v1605_v48 = vsel %vm928_vm7, %v1603_v44, %v2882_v13  ;;  %v1606_v6 = vsel %vm928_vm7, %v1604_v34, %v2883_v3  ;;  %v2916_v17 = vpop.permute.xlu0 %2915 }
 0x1c9   : > { %v2891_v10 = vpop.permute.xlu1 %2890  ;;  %v2918_v36 = vunpack.i.h.bf16 %v2916_v17  ;;  %v2917_v2 = vunpack.i.l.bf16 %v2916_v17 }
 0x1ca   : > { %v2893_v28 = vunpack.i.h.bf16 %v2891_v10  ;;  %v2892_v63 = vunpack.i.l.bf16 %v2891_v10 }
 0x1cb   : > { %v1593_v0 = vsel %vm931_vm8, %v1591_v20, %v2917_v2  ;;  %v1594_v52 = vsel %vm931_vm8, %v1592_v15, %v2918_v36 }
 0x1cc   : > { %v2402_v14 = vsel %vm928_vm7, %v2400_v45, %v2892_v63  ;;  %v2403_v12 = vsel %vm928_vm7, %v2401_v33, %v2893_v28  ;;  %v2926_v23 = vpop.permute.xlu0 %2925 }
 0x1cd   : > { %v2901_v4 = vpop.permute.xlu1 %2900  ;;  %v2928_v40 = vunpack.i.h.bf16 %v2926_v23  ;;  %v2927_v22 = vunpack.i.l.bf16 %v2926_v23 }
 0x1ce   : > { %v2903_v38 = vunpack.i.h.bf16 %v2901_v4  ;;  %v2902_v32 = vunpack.i.l.bf16 %v2901_v4 }
 0x1cf   : > { %v4790_v37 = vsel %vm931_vm8, %v2388_v7, %v2927_v22  ;;  %v4793_v5 = vsel %vm931_vm8, %v2389_v41, %v2928_v40 }
 0x1d0   : > { %v1607_v61 = vsel %vm931_vm8, %v1605_v48, %v2902_v32  ;;  %v1608_v27 = vsel %vm931_vm8, %v1606_v6, %v2903_v38  ;;  %v2936_v42 = vpop.permute.xlu0 %2935  ;;  %v1616_v32 = vld [vmem:[#allocation5 + $0x8] sm:$0xff] }
 0x1d1   : > { %v2911_v19 = vpop.permute.xlu1 %2910  ;;  %v2938_v49 = vunpack.i.h.bf16 %v2936_v42  ;;  %v2937_v53 = vunpack.i.l.bf16 %v2936_v42 }
 0x1d2   : > { %v2913_v29 = vunpack.i.h.bf16 %v2911_v19  ;;  %v2912_v16 = vunpack.i.l.bf16 %v2911_v19 }
 0x1d3   : > { %v1595_v62 = vsel %vm934_vm9, %v1593_v0, %v2937_v53  ;;  %v1596_v60 = vsel %vm934_vm9, %v1594_v52, %v2938_v49 }
 0x1d4   : > { %v2404_v30 = vsel %vm931_vm8, %v2402_v14, %v2912_v16  ;;  %v2405_v25 = vsel %vm931_vm8, %v2403_v12, %v2913_v29  ;;  %v2946_v58 = vpop.permute.xlu0 %2945 }
 0x1d5   : > { %v2921_v59 = vpop.permute.xlu1 %2920  ;;  %v2948_v10 = vunpack.i.h.bf16 %v2946_v58  ;;  %v2947_v36 = vunpack.i.l.bf16 %v2946_v58 }
 0x1d6   : > { %v2923_v11 = vunpack.i.h.bf16 %v2921_v59  ;;  %v2922_v34 = vunpack.i.l.bf16 %v2921_v59 }
 0x1d7   : > { %v2392_v42 = vsel %vm934_vm9, %v4790_v37, %v2947_v36  ;;  %v2393_v19 = vsel %vm934_vm9, %v4793_v5, %v2948_v10  ;;  %v2413_v5 = vld [vmem:[#allocation5 + $0x10] sm:$0xff] }
 0x1d8   : > { %v2956_v55 = vpop.permute.xlu0 %2955  ;;  %v1609_v45 = vsel %vm934_vm9, %v1607_v61, %v2922_v34  ;;  %v1610_v33 = vsel %vm934_vm9, %v1608_v27, %v2923_v11 }
 0x1d9   : > { %v2931_v21 = vpop.permute.xlu1 %2930  ;;  %v2958_v9 = vunpack.i.h.bf16 %v2956_v55  ;;  %v2957_v35 = vunpack.i.l.bf16 %v2956_v55 }
 0x1da   : > { %v2933_v54 = vunpack.i.h.bf16 %v2931_v21  ;;  %v2932_v8 = vunpack.i.l.bf16 %v2931_v21 }
 0x1db   : > { %v1597_v47 = vsel %vm937_vm10, %v1595_v62, %v2957_v35  ;;  %v1598_v57 = vsel %vm937_vm10, %v1596_v60, %v2958_v9 }
 0x1dc   : > { %v2966_v56 = vpop.permute.xlu0 %2965  ;;  %v2406_v63 = vsel %vm934_vm9, %v2404_v30, %v2932_v8  ;;  %v2407_v0 = vsel %vm934_vm9, %v2405_v25, %v2933_v54 }
 0x1dd   : > { %v2941_v46 = vpop.permute.xlu1 %2940  ;;  %v2968_v12 = vunpack.i.h.bf16 %v2966_v56  ;;  %v2967_v23 = vunpack.i.l.bf16 %v2966_v56 }
 0x1de   : > { %v2943_v39 = vunpack.i.h.bf16 %v2941_v46  ;;  %v2942_v31 = vunpack.i.l.bf16 %v2941_v46 }
 0x1df   : > { %v2394_v30 = vsel %vm937_vm10, %v2392_v42, %v2967_v23  ;;  %v2395_v25 = vsel %vm937_vm10, %v2393_v19, %v2968_v12 }
 0x1e0   : > { %v2976_v50 = vpop.permute.xlu0 %2975  ;;  %v1611_v41 = vsel %vm937_vm10, %v1609_v45, %v2942_v31  ;;  %v1612_v48 = vsel %vm937_vm10, %v1610_v33, %v2943_v39 }
 0x1e1   : > { %v2951_v44 = vpop.permute.xlu1 %2950  ;;  %v2978_v1 = vunpack.i.h.bf16 %v2976_v50  ;;  %v2977_v18 = vunpack.i.l.bf16 %v2976_v50 }
 0x1e2   : > { %v2953_v13 = vunpack.i.h.bf16 %v2951_v44  ;;  %v2952_v7 = vunpack.i.l.bf16 %v2951_v44 }
 0x1e3   : > { %v1599_v43 = vsel %vm940_vm11, %v1597_v47, %v2977_v18  ;;  %v1600_v20 = vsel %vm940_vm11, %v1598_v57, %v2978_v1 }
 0x1e4   : > { %v2656_v15 = vpack.c.bf16 %v1600_v20, %v1599_v43  ;;  %v2408_v4 = vsel %vm937_vm10, %v2406_v63, %v2952_v7  ;;  %v2409_v40 = vsel %vm937_vm10, %v2407_v0, %v2953_v13 }
 0x1e5   : > { %v2961_v51 = vpop.permute.xlu1 %2960 }
 0x1e6   : > { %v2963_v24 = vunpack.i.h.bf16 %v2961_v51  ;;  %v2962_v3 = vunpack.i.l.bf16 %v2961_v51 }
 0x1e8   : > { %v1613_v6 = vsel %vm940_vm11, %v1611_v41, %v2962_v3  ;;  %v1614_v17 = vsel %vm940_vm11, %v1612_v48, %v2963_v24 }
 0x1e9   : > { %v2971_v2 = vpop.permute.xlu1 %2970  ;;  %v2653_v28 = vpack.c.bf16 %v1614_v17, %v1613_v6 }
 0x1ea   : > { %v2973_v52 = vunpack.i.h.bf16 %v2971_v2  ;;  %v2972_v14 = vunpack.i.l.bf16 %v2971_v2 }
 0x1eb   : > { %2655 = vmatprep.subr.msk.bf16.mxu1 %vm4712_vm14, %v2653_v28 }
 0x1ec   : > { %v2410_v22 = vsel %vm940_vm11, %v2408_v4, %v2972_v14  ;;  %v2411_v38 = vsel %vm940_vm11, %v2409_v40, %v2973_v52  ;;  %2658 = vmatpush1.bf16.msk.msra.mxu1 %vm4712_vm14, %v2656_v15 }
 0x1ed   : > { %v2665_v61 = vpack.c.bf16 %v2411_v38, %v2410_v22  ;;  %v2981_v27 = vpop.permute.xlu1 %2980 }
 0x1ee   : > { %v2983_v29 = vunpack.i.h.bf16 %v2981_v27  ;;  %v2982_v16 = vunpack.i.l.bf16 %v2981_v27 }
 0x1ef   : > { %2667 = vmatprep.subr.msk.bf16.mxu0 %vm4712_vm14, %v2665_v61  ;;  %2639 = vmatmul.mubr.msk.f32.vlgmr.msra.gmra.mrb[0].mxu1 %vm1617_vm15, %v1616_v32 }
 0x1f0   : > { %v2397_v58 = vsel %vm940_vm11, %v2395_v25, %v2983_v29  ;;  %v2396_v37 = vsel %vm940_vm11, %v2394_v30, %v2982_v16 }
 0x1f1   : > { %v2668_v59 = vpack.c.bf16 %v2397_v58, %v2396_v37  ;;  %v2500_v53 = vpop.permute.xlu0 %2499 }
 0x1f3   : > { %2670 = vmatpush1.bf16.msk.msra.mxu0 %vm4712_vm14, %v2668_v59 }
 0x1f6   : > { %2645 = vmatmul.mubr.msk.f32.vlgmr.msra.gmra.mrb[0].mxu0 %vm1617_vm15, %v2413_v5 }
 0x2c2   : > { %v1694_v55 = vpop.f32.mrb[0].mxu1 }
 0x2c3   : > { %v1696_v21 = vpop.f32.mrb[1].mxu1 }
 0x2c9   : > { %v2489_v49 = vpop.f32.mrb[0].mxu0 }
 0x2ca   : > { %v2671_v56 = vadd.f32 %v2489_v49, %v1694_v55  ;;  %v2491_v46 = vpop.f32.mrb[1].mxu0 }
 0x2cb   : > { %v2672_v9 = vadd.f32 %v2491_v46, %v1696_v21 }
 0x2cc   : > { %v2502_v35 = vadd.f32 %v2671_v56, %v2500_v53 }
 0x2cd   : > { %v2503_v62 = vadd.f32 %v2672_v9, %v2500_v53 }
 0x2ce   : > { %2504 = vst [vmem:[%s229_s28] sm:$0xff] %v2502_v35 }
 0x2cf   : > { %2505 = vst [vmem:[%s229_s28 + $0x8] sm:$0xff] %v2503_v62 }
 0x2d0   : > { %3084 = shalt.err (!%p3081_p11)
}
 0x2d1   : > { %s3085_s25 = scalar_lea.hbm %s4840_s7, 256  ;;  %s3089_s26 = scalar_lea.hbm %s4892_s3, 512 }
 0x2d2   : > { %p3086_p0 = scmp.ne.s32.totalorder %s4840_s7, %s3085_s25  ;;  %p3090_p6 = scmp.lt.u32.totalorder %s4840_s7, %s4892_s3 }
 0x2d3   : > { %p3091_p7 = scmp.lt.u32.totalorder %s3089_s26, %s3085_s25  ;;  %p3093_p8 = scmp.lt.u32.totalorder %s3085_s25, %s4840_s7 }
 0x2d4   : > { %p3087_p4 = pnand %p3086_p0, %p5142_p2 }
 0x2d5   : > { %p3092_p12 = por %p3091_p7, %p3090_p6 }
 0x2d6   : > { %p3088_p13 = pneg %p3087_p4 }
 0x2d7   : > { %p3094_p1 = por %p3093_p8, %p3092_p12 }
 0x2d9   : > { %p3095_p10 = pnand %p3094_p1, %p3088_p13 }
 0x2db   : > { %3098 = shalt.err (!%p3095_p10)
}
 0x2dc   : > { %2685 = dma.vmem_to_hbm [thread:$0]  (%p5142_p2), %s4842_s29, 256, %s4840_s7, %s2507_s20  }
 0x2dd PF: > { %s2535_s30 = sand.u32 1, %s3137_s12   ;;  %p5143_p3 = scmp.ne.s32.totalorder %s4969_s23, 0 }
 0x2de   : > { %p5144_p5 = scmp.ge.s32.totalorder %s3157_s17, 2  ;;  %s2536_s21 = scalar_lea.sflag [#allocation4], %s2535_s30 }
 0x2e0   : > { %p2699_p9 = pnand %p5144_p5, %p5143_p3 }
 0x2e2   : > { %3132 = dma.done.wait (!%p2699_p9), %s2536_s21, 256  }
 0x2e3   : > { %3134 = vsyncadd (!%p2699_p9), %s2536_s21, 4294967040  ;;  %s20_s17 = sadd.s32 1, %s3157_s17   ;;  %s5145_s12 = smov %s3141_s13 }
 0x2e4   : > { %p17_p11 = scmp.ge.s32.totalorder %s20_s17, 4   ;;  %s5146_s13 = smov %s3145_s14 }
 0x2e5   : > { %s5147_s14 = smov %s3344_s5  ;;  %s5148_s15 = smov %s3153_s16 }
 0x2e6   : > { %s5149_s16 = smov %s5151_s19  ;;  %19 = sbr.rel (!%p17_p11) target bundleno = 7 (0x7), region = 87 }
 0x2ed   :  { %2541 = vsyncpa [#allocation3], 1 }
 0x2ee   :  { %2543 = vsyncpa [#allocation3 + $0x1], 1 }
 0x2ef   :  { %2544 = vsyncpa [#allocation6], 1 }
 0x2f0   :  { %2545 = vsyncpa [#allocation4], 1 }
 0x2f1   :  { %2547 = vsyncpa [#allocation4 + $0x1], 1 }

</bundles_post_ra>
